<compile_context>
chip_gen: v7x
topology: tpu7x:2x2x1
jax: 0.10.0
libtpu: 0.0.40
codegen_flags: <defaults>
</compile_context>

<pallas_src>
import functools

import jax
import jax.numpy as jnp
from jax.experimental import pallas as pl
from jax.experimental.pallas import tpu as pltpu


def _rpe_attention_kernel(
    xq_ref, xp_ref, kt_ref, vh_ref,
    wq_ref, bq_ref, wpt_ref, woh_ref, bo_ref, lnw_ref, lnb_ref,
    out_ref, attn_ref,
    *, num_head: int, ln_eps: float, compute_dtype,
):
    H = num_head
    cd = compute_dtype

    x_q_f32 = xq_ref[0].astype(jnp.float32)      # (TN, C) residual path (exact)
    x_q = x_q_f32.astype(cd)                     # (TN, C) MXU operand
    x_p = xp_ref[0]                              # (TN, M, C), already compute dtype
    k_t = kt_ref[0]                              # (H, d, M) pre-projected K^T
    v_h = vh_ref[0]                              # (H, M, d) pre-projected V

    TN, C = x_q_f32.shape
    d = C // H
    scale = 1.0 / (d ** 0.5)

    # Query projection (bias included): one dense (TN,C)x(C,C) MXU matmul,
    # then split into heads (head-major layout for everything downstream).
    q_full = jnp.dot(x_q, wq_ref[...], preferred_element_type=jnp.float32) + bq_ref[0]
    q_heads = jnp.transpose(q_full.reshape(TN, H, d), (1, 0, 2)).astype(cd)     # (H, TN, d)

    # Un-folded relative-position query: r[h,n,c] = sum_d q[h,n,d] * Wp[c, h*d + d'].
    # (bp adds a per-(n,h) constant to the logits -> softmax-invariant -> dropped.)
    r_hnc = jnp.einsum('hnd,hdc->hnc', q_heads, wpt_ref[...],
                       preferred_element_type=jnp.float32)                       # (H, TN, C)

    # attention_scores_e = q . k^T, head-batched (K pre-projected/transposed).
    scores_e = jnp.einsum('hnd,hdm->hnm', q_heads, k_t,
                          preferred_element_type=jnp.float32)                    # (H, TN, M)

    # attention_scores_p: single n-batched dot_general with H LHS rows per push;
    # the (TN, M, C) position tile is read once (not once per head).
    r_nhc = jnp.transpose(r_hnc, (1, 0, 2)).astype(cd)                           # (TN, H, C)
    scores_p = jnp.einsum('nhc,nmc->nhm', r_nhc, x_p,
                          preferred_element_type=jnp.float32)                    # (TN, H, M)
    scores_p = jnp.transpose(scores_p, (1, 0, 2))                                # (H, TN, M)

    scores = (scores_e + scores_p) * scale
    # TODO(synk): key_masks / memory_masks path omitted (None in this config).
    scores = scores - jnp.max(scores, axis=-1, keepdims=True)
    e = jnp.exp(scores)
    attn = e / jnp.sum(e, axis=-1, keepdims=True)   # exact divide: endpoint rows sum to 1

    # Post-softmax attention endpoint: one lane-dense (H, TN, M) store per tile.
    attn_ref[0] = attn.astype(attn_ref.dtype)

    # TODO(synk): attention / output dropout omitted (eval mode -> identity).
    head_out = jnp.einsum('hnm,hmd->hnd', attn.astype(cd), v_h,
                          preferred_element_type=jnp.float32)                    # (H, TN, d)

    # Fold each head through the per-head rows of the output projection
    # (no concatenate, no sub-128 lane slicing).
    acc = jnp.zeros((TN, C), jnp.float32)
    for h in range(H):
        acc = acc + jnp.dot(head_out[h].astype(cd), woh_ref[h],
                            preferred_element_type=jnp.float32)                  # (TN, C)
    hidden = acc + bo_ref[0]

    # Residual + LayerNorm over C (biased variance, eps like nn.LayerNorm), f32.
    res = hidden + x_q_f32
    mean = jnp.mean(res, axis=-1, keepdims=True)
    var = jnp.mean((res - mean) ** 2, axis=-1, keepdims=True)
    out = (res - mean) * jax.lax.rsqrt(var + ln_eps) * lnw_ref[0] + lnb_ref[0]
    out_ref[0] = out.astype(out_ref.dtype)


def _round_up(x, m):
    return ((x + m - 1) // m) * m


def _vmem_capacity_bytes():
    """Per-core VMEM capacity; conservative (v7x-class) fallback if unknown."""
    try:
        return int(pltpu.get_tpu_info().vmem_capacity_bytes)
    except Exception:
        return 64 * 1024 * 1024


def _plan_tiles(N, M, C, H, *, xp_bytes, in_bytes, out_bytes, attn_bytes, cd_bytes):
    """Derive the query tile TN, padded N and vmem_limit from the VMEM budget."""
    d = C // H
    capacity = _vmem_capacity_bytes()
    budget = int(capacity * 0.75)   # headroom for Mosaic internal scratch / spills

    # Bytes that scale with TN: double-buffered pipeline blocks + in-kernel temps.
    per_row = (2 * M * C * xp_bytes          # position tile (dominant stream)
               + 2 * C * in_bytes            # query tile
               + 2 * C * out_bytes           # output tile
               + 2 * H * M * attn_bytes      # attention-endpoint tile
               + 6 * H * M * 4               # scores_e/p (+transposed), exp, sums (f32)
               + H * M * cd_bytes            # attn in compute dtype
               + H * C * (4 + cd_bytes)      # r (f32 + cd)
               + 4 * C * 4)                  # q / acc / residual rows
    fixed = (4 * M * C * cd_bytes            # K^T + V blocks, double-buffered
             + 2 * (C * C + 2 * H * d * C) * cd_bytes + 8 * C * 4   # weights + biases
             + (2 << 20))                    # misc headroom

    tn_cap = max(8, ((budget - fixed) // per_row) // 8 * 8)
    tn_cap = min(tn_cap, 256)                # 256 fills the wide v6e/v7x MXU; v5e ok at >=128

    n_tiles = -(-N // tn_cap)
    TN = min(tn_cap, _round_up(-(-N // n_tiles), 8))
    n_pad = TN * n_tiles

    est = fixed + TN * per_row
    vmem_limit = max(32 * 1024 * 1024, int(est * 1.4))
    vmem_limit = int(min(vmem_limit, capacity - (8 << 20)))   # not capped at 64 MiB on v5e/v6e
    vmem_limit = max(vmem_limit, 16 << 20)
    return TN, n_pad, vmem_limit


def rpe_attention_layer(input_states, memory_states, position_states, params,
                        num_head, compute_dtype=jnp.bfloat16,
                        attn_dtype=jnp.float32):
    B, N, C = input_states.shape
    M = memory_states.shape[1]
    H = num_head
    if C % H != 0:
        raise ValueError('`d_model` must be a multiple of `num_head`.')
    d = C // H
    cd = compute_dtype

    # ---- XLA-side precomputation (tiny vs. the streamed position tensor) ----
    # K / V are constant across the query-tile grid axis: project once here.
    k_all = memory_states @ params['wk'] + params['bk'][0]                        # (B, M, C)
    v_all = memory_states @ params['wv'] + params['bv'][0]                        # (B, M, C)
    k_t = jnp.transpose(k_all.reshape(B, M, H, d), (0, 2, 3, 1)).astype(cd)       # (B, H, d, M)
    v_h = jnp.transpose(v_all.reshape(B, M, H, d), (0, 2, 1, 3)).astype(cd)       # (B, H, M, d)

    # Un-folded per-head position weight: wp_t[h, d', c] = Wp[c, h*d + d'].
    wp_t = jnp.transpose(params['wp'].reshape(C, H, d), (1, 2, 0)).astype(cd)     # (H, d, C)
    wo_h = params['wo'].reshape(H, d, C).astype(cd)                               # (H, d, C)
    wq = params['wq'].astype(cd)                                                  # (C, C)

    # Stream the dominant HBM tensor in the compute dtype (ideally the caller
    # already produces bf16 position_states; this cast is one XLA pass).
    x_p = position_states.astype(cd)

    # ---- tile / VMEM planning (per-generation: v7x shrinks TN, v5e/v6e grow) ----
    itemsize = lambda dt: jnp.dtype(dt).itemsize
    TN, n_pad, vmem_limit = _plan_tiles(
        N, M, C, H,
        xp_bytes=itemsize(cd), in_bytes=itemsize(input_states.dtype),
        out_bytes=itemsize(input_states.dtype), attn_bytes=itemsize(attn_dtype),
        cd_bytes=itemsize(cd))

    if n_pad != N:
        pad = n_pad - N
        input_q = jnp.pad(input_states, ((0, 0), (0, pad), (0, 0)))
        x_p = jnp.pad(x_p, ((0, 0), (0, pad), (0, 0), (0, 0)))
    else:
        input_q = input_states
    n_tiles = n_pad // TN

    kernel = functools.partial(_rpe_attention_kernel, num_head=H,
                               ln_eps=1e-5, compute_dtype=cd)

    w2 = lambda b, i: (0, 0)
    w3 = lambda b, i: (0, 0, 0)

    in_specs = [
        pl.BlockSpec((1, TN, C), lambda b, i: (b, i, 0)),          # input_states
        pl.BlockSpec((1, TN, M, C), lambda b, i: (b, i, 0, 0)),    # position_states (cd)
        pl.BlockSpec((1, H, d, M), lambda b, i: (b, 0, 0, 0)),     # K^T (pre-projected)
        pl.BlockSpec((1, H, M, d), lambda b, i: (b, 0, 0, 0)),     # V  (pre-projected)
        pl.BlockSpec((C, C), w2), pl.BlockSpec((1, C), w2),        # proj_q weight / bias
        pl.BlockSpec((H, d, C), w3),                               # Wp^T per head (un-folded)
        pl.BlockSpec((H, d, C), w3), pl.BlockSpec((1, C), w2),     # output linear (per-head rows)
        pl.BlockSpec((1, C), w2), pl.BlockSpec((1, C), w2),        # layer norm w / b
    ]
    out_specs = [
        pl.BlockSpec((1, TN, C), lambda b, i: (b, i, 0)),          # output_states
        pl.BlockSpec((1, H, TN, M), lambda b, i: (b, 0, i, 0)),    # attention_scores
    ]
    out_shape = [
        jax.ShapeDtypeStruct((B, n_pad, C), input_states.dtype),
        # NOTE: attn_dtype=jnp.bfloat16 halves the endpoint HBM writeback / VMEM
        # block if the downstream consumer tolerates it.
        jax.ShapeDtypeStruct((B, H, n_pad, M), attn_dtype),
    ]

    out, attn = pl.pallas_call(
        kernel,
        grid=(B, n_tiles),
        in_specs=in_specs,
        out_specs=out_specs,
        out_shape=out_shape,
        compiler_params=pltpu.CompilerParams(
            dimension_semantics=("parallel", "parallel"),
            vmem_limit_bytes=vmem_limit,
        ),
    )(
        input_q, x_p, k_t, v_h,
        wq, params['bq'], wp_t, wo_h, params['bo'], params['ln_w'], params['ln_b'],
    )

    if n_pad != N:
        out = out[:, :N]
        attn = attn[:, :, :N]
    return out, attn


def reference(input_states, memory_states, position_states, params, num_head):
    """Pure-JAX (f32) reference reproducing the PyTorch forward (eval mode)."""
    B, N, C = input_states.shape
    M = memory_states.shape[1]
    d = C // num_head
    q = input_states @ params['wq'] + params['bq'][0]
    k = memory_states @ params['wk'] + params['bk'][0]
    v = memory_states @ params['wv'] + params['bv'][0]
    p = jnp.einsum('bnmc,cd->bnmd', position_states, params['wp']) + params['bp'][0]
    qh = q.reshape(B, N, num_head, d).transpose(0, 2, 1, 3)
    kh = k.reshape(B, M, num_head, d).transpose(0, 2, 1, 3)
    vh = v.reshape(B, M, num_head, d).transpose(0, 2, 1, 3)
    ph = p.reshape(B, N, M, num_head, d).transpose(0, 3, 1, 2, 4)
    se = jnp.einsum('bhnd,bhmd->bhnm', qh, kh)
    sp = jnp.einsum('bhnd,bhnmd->bhnm', qh, ph)
    attn = jax.nn.softmax((se + sp) / d ** 0.5, axis=-1)
    hid = jnp.einsum('bhnm,bhmd->bhnd', attn, vh).transpose(0, 2, 1, 3).reshape(B, N, C)
    hid = hid @ params['wo'] + params['bo'][0]
    res = hid + input_states
    mean = res.mean(-1, keepdims=True)
    var = ((res - mean) ** 2).mean(-1, keepdims=True)
    out = (res - mean) / jnp.sqrt(var + 1e-5) * params['ln_w'][0] + params['ln_b'][0]
    return out, attn


def make_params(key, d_model):
    ks = jax.random.split(key, 10)
    C = d_model

    def lin(kw, kb):
        return (0.1 * jax.random.normal(kw, (C, C), jnp.float32),
                0.01 * jax.random.normal(kb, (1, C), jnp.float32))

    wq, bq = lin(ks[0], ks[1])
    wk, bk = lin(ks[2], ks[3])
    wv, bv = lin(ks[4], ks[5])
    wp, bp = lin(ks[6], ks[7])
    wo, bo = lin(ks[8], ks[9])
    return dict(
        wq=wq, bq=bq, wk=wk, bk=bk, wv=wv, bv=bv, wp=wp, bp=bp, wo=wo, bo=bo,
        ln_w=jnp.ones((1, C), jnp.float32), ln_b=jnp.zeros((1, C), jnp.float32),
    )


if __name__ == "__main__":
    B, N, M, C, H = 2, 8, 16, 32, 4  # batch, query len, memory len, d_model, heads

    key = jax.random.PRNGKey(0)
    k_in, k_mem, k_pos, k_par = jax.random.split(key, 4)
    input_states = jax.random.normal(k_in, (B, N, C), jnp.float32)
    memory_states = jax.random.normal(k_mem, (B, M, C), jnp.float32)
    position_states = jax.random.normal(k_pos, (B, N, M, C), jnp.float32)
    params = make_params(k_par, C)

    out, attn = rpe_attention_layer(input_states, memory_states, position_states,
                                    params, num_head=H)
    out = jax.block_until_ready(out)
    attn = jax.block_until_ready(attn)

    ref_out, ref_attn = reference(input_states, memory_states, position_states,
                                  params, num_head=H)

    assert out.shape == (B, N, C) and attn.shape == (B, H, N, M)
    err_attn = float(jnp.max(jnp.abs(attn - ref_attn)))
    err_out = float(jnp.max(jnp.abs(out - ref_out)))
    # Precision contract: bf16 MXU operands vs. the f32 reference -> loosened
    # tolerances (softmax denominator itself is an exact f32 divide).
    assert jnp.allclose(attn, ref_attn, atol=2e-2, rtol=5e-2), err_attn
    assert jnp.allclose(out, ref_out, atol=3e-2, rtol=3e-2), err_out

    print("KERNEL_OK")
</pallas_src>

<mosaic_0001>
module attributes {stable_mosaic.version = 11 : i64} {
  func.func @_rpe_attention_kernel(%arg0: i32, %arg1: i32, %arg2: memref<1x8x32xf32, #tpu.memory_space<vmem>>, %arg3: memref<1x8x16x32xbf16, #tpu.memory_space<vmem>>, %arg4: memref<1x4x8x16xbf16, #tpu.memory_space<vmem>>, %arg5: memref<1x4x16x8xbf16, #tpu.memory_space<vmem>>, %arg6: memref<32x32xbf16, #tpu.memory_space<vmem>>, %arg7: memref<1x32xf32, #tpu.memory_space<vmem>>, %arg8: memref<4x8x32xbf16, #tpu.memory_space<vmem>>, %arg9: memref<4x8x32xbf16, #tpu.memory_space<vmem>>, %arg10: memref<1x32xf32, #tpu.memory_space<vmem>>, %arg11: memref<1x32xf32, #tpu.memory_space<vmem>>, %arg12: memref<1x32xf32, #tpu.memory_space<vmem>>, %arg13: memref<1x8x32xf32, #tpu.memory_space<vmem>>, %arg14: memref<1x4x8x16xf32, #tpu.memory_space<vmem>>) attributes {dimension_semantics = [#tpu.dimension_semantics<parallel>, #tpu.dimension_semantics<parallel>], iteration_bounds = array<i64: 2, 1>, scalar_prefetch = 0 : i64, scratch_operands = 0 : i64, tpu.core_type = #tpu.core_type<tc>, window_params = [{transform_indices = @transform_0, window_bounds = array<i64: 1, 8, 32>}, {transform_indices = @transform_1, window_bounds = array<i64: 1, 8, 16, 32>}, {transform_indices = @transform_2, window_bounds = array<i64: 1, 4, 8, 16>}, {transform_indices = @transform_3, window_bounds = array<i64: 1, 4, 16, 8>}, {pipeline_mode = #tpu.pipeline_mode<synchronous>, transform_indices = @transform_4, window_bounds = array<i64: 32, 32>}, {pipeline_mode = #tpu.pipeline_mode<synchronous>, transform_indices = @transform_5, window_bounds = array<i64: 1, 32>}, {pipeline_mode = #tpu.pipeline_mode<synchronous>, transform_indices = @transform_6, window_bounds = array<i64: 4, 8, 32>}, {pipeline_mode = #tpu.pipeline_mode<synchronous>, transform_indices = @transform_7, window_bounds = array<i64: 4, 8, 32>}, {pipeline_mode = #tpu.pipeline_mode<synchronous>, transform_indices = @transform_8, window_bounds = array<i64: 1, 32>}, {pipeline_mode = #tpu.pipeline_mode<synchronous>, transform_indices = @transform_9, window_bounds = array<i64: 1, 32>}, {pipeline_mode = #tpu.pipeline_mode<synchronous>, transform_indices = @transform_10, window_bounds = array<i64: 1, 32>}, {transform_indices = @transform_11, window_bounds = array<i64: 1, 8, 32>}, {transform_indices = @transform_12, window_bounds = array<i64: 1, 4, 8, 16>}]} {
    %c0 = arith.constant 0 : index
    %c0_0 = arith.constant 0 : index
    %c0_1 = arith.constant 0 : index
    %0 = vector.load %arg2[%c0, %c0_0, %c0_1] : memref<1x8x32xf32, #tpu.memory_space<vmem>>, vector<1x8x32xf32>
    %1 = vector.shape_cast %0 : vector<1x8x32xf32> to vector<8x32xf32>
    %2 = arith.truncf %1 : vector<8x32xf32> to vector<8x32xbf16>
    %c0_2 = arith.constant 0 : index
    %c0_3 = arith.constant 0 : index
    %c0_4 = arith.constant 0 : index
    %c0_5 = arith.constant 0 : index
    %3 = vector.load %arg3[%c0_2, %c0_3, %c0_4, %c0_5] : memref<1x8x16x32xbf16, #tpu.memory_space<vmem>>, vector<1x8x16x32xbf16>
    %4 = vector.shape_cast %3 : vector<1x8x16x32xbf16> to vector<8x16x32xbf16>
    %c0_6 = arith.constant 0 : index
    %c0_7 = arith.constant 0 : index
    %c0_8 = arith.constant 0 : index
    %c0_9 = arith.constant 0 : index
    %5 = vector.load %arg4[%c0_6, %c0_7, %c0_8, %c0_9] : memref<1x4x8x16xbf16, #tpu.memory_space<vmem>>, vector<1x4x8x16xbf16>
    %6 = vector.shape_cast %5 : vector<1x4x8x16xbf16> to vector<4x8x16xbf16>
    %c0_10 = arith.constant 0 : index
    %c0_11 = arith.constant 0 : index
    %c0_12 = arith.constant 0 : index
    %c0_13 = arith.constant 0 : index
    %7 = vector.load %arg5[%c0_10, %c0_11, %c0_12, %c0_13] : memref<1x4x16x8xbf16, #tpu.memory_space<vmem>>, vector<1x4x16x8xbf16>
    %8 = vector.shape_cast %7 : vector<1x4x16x8xbf16> to vector<4x16x8xbf16>
    %c0_14 = arith.constant 0 : index
    %c0_15 = arith.constant 0 : index
    %9 = vector.load %arg6[%c0_14, %c0_15] : memref<32x32xbf16, #tpu.memory_space<vmem>>, vector<32x32xbf16>
    %cst = arith.constant dense<0.000000e+00> : vector<8x32xf32>
    %10 = tpu.matmul %2, %9, %cst {dimension_numbers = #tpu.dot_dimension_numbers<[1], [0], [0], [1], [0, 0, 1, 1], [], []>} : vector<8x32xbf16>, vector<32x32xbf16>, vector<8x32xf32> -> vector<8x32xf32>
    %c0_16 = arith.constant 0 : index
    %c0_17 = arith.constant 0 : index
    %11 = vector.load %arg7[%c0_16, %c0_17] : memref<1x32xf32, #tpu.memory_space<vmem>>, vector<1x32xf32>
    %12 = vector.shape_cast %11 : vector<1x32xf32> to vector<32xf32>
    %13 = vector.shape_cast %12 : vector<32xf32> to vector<1x32xf32>
    %14 = vector.broadcast %13 : vector<1x32xf32> to vector<8x32xf32>
    %15 = arith.addf %10, %14 : vector<8x32xf32>
    %16 = vector.shape_cast %15 : vector<8x32xf32> to vector<8x4x8xf32>
    %17 = tpu.transpose %16, [1, 0, 2] : vector<8x4x8xf32> -> vector<4x8x8xf32>
    %18 = arith.truncf %17 : vector<4x8x8xf32> to vector<4x8x8xbf16>
    %c0_18 = arith.constant 0 : index
    %c0_19 = arith.constant 0 : index
    %c0_20 = arith.constant 0 : index
    %19 = vector.load %arg8[%c0_18, %c0_19, %c0_20] : memref<4x8x32xbf16, #tpu.memory_space<vmem>>, vector<4x8x32xbf16>
    "tpu.trace_start"() <{level = 10 : i32, message = "hnd,hdc->hnc"}> : () -> ()
    %cst_21 = arith.constant dense<0.000000e+00> : vector<4x8x32xf32>
    %20 = tpu.matmul %18, %19, %cst_21 {dimension_numbers = #tpu.dot_dimension_numbers<[2], [1], [1], [2], [0, 0, 0, 1, 1, 2], [0], [0]>} : vector<4x8x8xbf16>, vector<4x8x32xbf16>, vector<4x8x32xf32> -> vector<4x8x32xf32>
    "tpu.trace_stop"() : () -> ()
    "tpu.trace_start"() <{level = 10 : i32, message = "hnd,hdm->hnm"}> : () -> ()
    %cst_22 = arith.constant dense<0.000000e+00> : vector<4x8x16xf32>
    %21 = tpu.matmul %18, %6, %cst_22 {dimension_numbers = #tpu.dot_dimension_numbers<[2], [1], [1], [2], [0, 0, 0, 1, 1, 2], [0], [0]>} : vector<4x8x8xbf16>, vector<4x8x16xbf16>, vector<4x8x16xf32> -> vector<4x8x16xf32>
    "tpu.trace_stop"() : () -> ()
    %22 = tpu.transpose %20, [1, 0, 2] : vector<4x8x32xf32> -> vector<8x4x32xf32>
    %23 = arith.truncf %22 : vector<8x4x32xf32> to vector<8x4x32xbf16>
    "tpu.trace_start"() <{level = 10 : i32, message = "nhc,nmc->nhm"}> : () -> ()
    %cst_23 = arith.constant dense<0.000000e+00> : vector<8x4x16xf32>
    %24 = tpu.matmul %23, %4, %cst_23 {dimension_numbers = #tpu.dot_dimension_numbers<[2], [2], [1], [1], [0, 0, 0, 1, 1, 1], [0], [0]>} : vector<8x4x32xbf16>, vector<8x16x32xbf16>, vector<8x4x16xf32> -> vector<8x4x16xf32>
    "tpu.trace_stop"() : () -> ()
    %25 = tpu.transpose %24, [1, 0, 2] : vector<8x4x16xf32> -> vector<4x8x16xf32>
    %26 = arith.addf %21, %25 : vector<4x8x16xf32>
    %cst_24 = arith.constant 0.353553385 : f32
    %27 = vector.broadcast %cst_24 : f32 to vector<4x8x16xf32>
    %28 = arith.mulf %26, %27 : vector<4x8x16xf32>
    %cst_25 = arith.constant dense<0xFF800000> : vector<4x8xf32>
    %29 = vector.multi_reduction <maximumf>, %28, %cst_25 [2] : vector<4x8x16xf32> to vector<4x8xf32>
    %30 = vector.shape_cast %29 : vector<4x8xf32> to vector<4x8x1xf32>
    %31 = vector.broadcast %30 : vector<4x8x1xf32> to vector<4x8x16xf32>
    %32 = arith.subf %28, %31 : vector<4x8x16xf32>
    %33 = math.exp %32 : vector<4x8x16xf32>
    %cst_26 = arith.constant dense<0.000000e+00> : vector<4x8xf32>
    %34 = vector.multi_reduction <add>, %33, %cst_26 [2] : vector<4x8x16xf32> to vector<4x8xf32>
    %35 = vector.shape_cast %34 : vector<4x8xf32> to vector<4x8x1xf32>
    %36 = vector.broadcast %35 : vector<4x8x1xf32> to vector<4x8x16xf32>
    %37 = arith.divf %33, %36 : vector<4x8x16xf32>
    %c0_27 = arith.constant 0 : index
    %c0_28 = arith.constant 0 : index
    %c0_29 = arith.constant 0 : index
    %c0_30 = arith.constant 0 : index
    %38 = vector.load %arg14[%c0_27, %c0_28, %c0_29, %c0_30] : memref<1x4x8x16xf32, #tpu.memory_space<vmem>>, vector<1x4x8x16xf32>
    %39 = vector.shape_cast %38 : vector<1x4x8x16xf32> to vector<4x8x16xf32>
    %40 = vector.shape_cast %37 : vector<4x8x16xf32> to vector<1x4x8x16xf32>
    tpu.vector_store %arg14[%c0_27, %c0_28, %c0_29, %c0_30], %40 {strides = array<i32>} : memref<1x4x8x16xf32, #tpu.memory_space<vmem>>, vector<1x4x8x16xf32>,
    %41 = arith.truncf %37 : vector<4x8x16xf32> to vector<4x8x16xbf16>
    "tpu.trace_start"() <{level = 10 : i32, message = "hnm,hmd->hnd"}> : () -> ()
    %cst_31 = arith.constant dense<0.000000e+00> : vector<4x8x8xf32>
    %42 = tpu.matmul %41, %8, %cst_31 {dimension_numbers = #tpu.dot_dimension_numbers<[2], [1], [1], [2], [0, 0, 0, 1, 1, 2], [0], [0]>} : vector<4x8x16xbf16>, vector<4x16x8xbf16>, vector<4x8x8xf32> -> vector<4x8x8xf32>
    %cst_32 = arith.constant 0.000000e+00 : f32
    "tpu.trace_stop"() : () -> ()
    %43 = vector.broadcast %cst_32 : f32 to vector<8x32xf32>
    %44 = vector.extract_strided_slice %42 {offsets = [0, 0, 0], sizes = [1, 8, 8], strides = [1, 1, 1]} : vector<4x8x8xf32> to vector<1x8x8xf32>
    %45 = vector.shape_cast %44 : vector<1x8x8xf32> to vector<8x8xf32>
    %46 = arith.truncf %45 : vector<8x8xf32> to vector<8x8xbf16>
    %c0_33 = arith.constant 0 : index
    %c0_34 = arith.constant 0 : index
    %c0_35 = arith.constant 0 : index
    %47 = vector.load %arg9[%c0_33, %c0_34, %c0_35] : memref<4x8x32xbf16, #tpu.memory_space<vmem>>, vector<1x8x32xbf16>
    %48 = vector.shape_cast %47 : vector<1x8x32xbf16> to vector<8x32xbf16>
    %cst_36 = arith.constant dense<0.000000e+00> : vector<8x32xf32>
    %49 = tpu.matmul %46, %48, %cst_36 {dimension_numbers = #tpu.dot_dimension_numbers<[1], [0], [0], [1], [0, 0, 1, 1], [], []>} : vector<8x8xbf16>, vector<8x32xbf16>, vector<8x32xf32> -> vector<8x32xf32>
    %50 = arith.addf %43, %49 : vector<8x32xf32>
    %51 = vector.extract_strided_slice %42 {offsets = [1, 0, 0], sizes = [1, 8, 8], strides = [1, 1, 1]} : vector<4x8x8xf32> to vector<1x8x8xf32>
    %52 = vector.shape_cast %51 : vector<1x8x8xf32> to vector<8x8xf32>
    %53 = arith.truncf %52 : vector<8x8xf32> to vector<8x8xbf16>
    %c1 = arith.constant 1 : index
    %c0_37 = arith.constant 0 : index
    %c0_38 = arith.constant 0 : index
    %54 = vector.load %arg9[%c1, %c0_37, %c0_38] : memref<4x8x32xbf16, #tpu.memory_space<vmem>>, vector<1x8x32xbf16>
    %55 = vector.shape_cast %54 : vector<1x8x32xbf16> to vector<8x32xbf16>
    %cst_39 = arith.constant dense<0.000000e+00> : vector<8x32xf32>
    %56 = tpu.matmul %53, %55, %cst_39 {dimension_numbers = #tpu.dot_dimension_numbers<[1], [0], [0], [1], [0, 0, 1, 1], [], []>} : vector<8x8xbf16>, vector<8x32xbf16>, vector<8x32xf32> -> vector<8x32xf32>
    %57 = arith.addf %50, %56 : vector<8x32xf32>
    %58 = vector.extract_strided_slice %42 {offsets = [2, 0, 0], sizes = [1, 8, 8], strides = [1, 1, 1]} : vector<4x8x8xf32> to vector<1x8x8xf32>
    %59 = vector.shape_cast %58 : vector<1x8x8xf32> to vector<8x8xf32>
    %60 = arith.truncf %59 : vector<8x8xf32> to vector<8x8xbf16>
    %c2 = arith.constant 2 : index
    %c0_40 = arith.constant 0 : index
    %c0_41 = arith.constant 0 : index
    %61 = vector.load %arg9[%c2, %c0_40, %c0_41] : memref<4x8x32xbf16, #tpu.memory_space<vmem>>, vector<1x8x32xbf16>
    %62 = vector.shape_cast %61 : vector<1x8x32xbf16> to vector<8x32xbf16>
    %cst_42 = arith.constant dense<0.000000e+00> : vector<8x32xf32>
    %63 = tpu.matmul %60, %62, %cst_42 {dimension_numbers = #tpu.dot_dimension_numbers<[1], [0], [0], [1], [0, 0, 1, 1], [], []>} : vector<8x8xbf16>, vector<8x32xbf16>, vector<8x32xf32> -> vector<8x32xf32>
    %64 = arith.addf %57, %63 : vector<8x32xf32>
    %65 = vector.extract_strided_slice %42 {offsets = [3, 0, 0], sizes = [1, 8, 8], strides = [1, 1, 1]} : vector<4x8x8xf32> to vector<1x8x8xf32>
    %66 = vector.shape_cast %65 : vector<1x8x8xf32> to vector<8x8xf32>
    %67 = arith.truncf %66 : vector<8x8xf32> to vector<8x8xbf16>
    %c3 = arith.constant 3 : index
    %c0_43 = arith.constant 0 : index
    %c0_44 = arith.constant 0 : index
    %68 = vector.load %arg9[%c3, %c0_43, %c0_44] : memref<4x8x32xbf16, #tpu.memory_space<vmem>>, vector<1x8x32xbf16>
    %69 = vector.shape_cast %68 : vector<1x8x32xbf16> to vector<8x32xbf16>
    %cst_45 = arith.constant dense<0.000000e+00> : vector<8x32xf32>
    %70 = tpu.matmul %67, %69, %cst_45 {dimension_numbers = #tpu.dot_dimension_numbers<[1], [0], [0], [1], [0, 0, 1, 1], [], []>} : vector<8x8xbf16>, vector<8x32xbf16>, vector<8x32xf32> -> vector<8x32xf32>
    %71 = arith.addf %64, %70 : vector<8x32xf32>
    %c0_46 = arith.constant 0 : index
    %c0_47 = arith.constant 0 : index
    %72 = vector.load %arg10[%c0_46, %c0_47] : memref<1x32xf32, #tpu.memory_space<vmem>>, vector<1x32xf32>
    %73 = vector.shape_cast %72 : vector<1x32xf32> to vector<32xf32>
    %74 = vector.shape_cast %73 : vector<32xf32> to vector<1x32xf32>
    %75 = vector.broadcast %74 : vector<1x32xf32> to vector<8x32xf32>
    %76 = arith.addf %71, %75 : vector<8x32xf32>
    %77 = arith.addf %76, %1 : vector<8x32xf32>
    %cst_48 = arith.constant dense<0.000000e+00> : vector<8xf32>
    %78 = vector.multi_reduction <add>, %77, %cst_48 [1] : vector<8x32xf32> to vector<8xf32>
    %79 = vector.shape_cast %78 : vector<8xf32> to vector<8x1xf32>
    %cst_49 = arith.constant 3.200000e+01 : f32
    %80 = vector.broadcast %cst_49 : f32 to vector<8x1xf32>
    %81 = arith.divf %79, %80 : vector<8x1xf32>
    %82 = vector.broadcast %81 : vector<8x1xf32> to vector<8x32xf32>
    %83 = arith.subf %77, %82 : vector<8x32xf32>
    %84 = arith.mulf %83, %83 : vector<8x32xf32>
    %cst_50 = arith.constant dense<0.000000e+00> : vector<8xf32>
    %85 = vector.multi_reduction <add>, %84, %cst_50 [1] : vector<8x32xf32> to vector<8xf32>
    %86 = vector.shape_cast %85 : vector<8xf32> to vector<8x1xf32>
    %cst_51 = arith.constant 3.200000e+01 : f32
    %87 = vector.broadcast %cst_51 : f32 to vector<8x1xf32>
    %88 = arith.divf %86, %87 : vector<8x1xf32>
    %89 = vector.broadcast %81 : vector<8x1xf32> to vector<8x32xf32>
    %90 = arith.subf %77, %89 : vector<8x32xf32>
    %cst_52 = arith.constant 9.99999974E-6 : f32
    %91 = vector.broadcast %cst_52 : f32 to vector<8x1xf32>
    %92 = arith.addf %88, %91 : vector<8x1xf32>
    %93 = math.rsqrt %92 : vector<8x1xf32>
    %94 = vector.broadcast %93 : vector<8x1xf32> to vector<8x32xf32>
    %95 = arith.mulf %90, %94 : vector<8x32xf32>
    %c0_53 = arith.constant 0 : index
    %c0_54 = arith.constant 0 : index
    %96 = vector.load %arg11[%c0_53, %c0_54] : memref<1x32xf32, #tpu.memory_space<vmem>>, vector<1x32xf32>
    %97 = vector.shape_cast %96 : vector<1x32xf32> to vector<32xf32>
    %98 = vector.shape_cast %97 : vector<32xf32> to vector<1x32xf32>
    %99 = vector.broadcast %98 : vector<1x32xf32> to vector<8x32xf32>
    %100 = arith.mulf %95, %99 : vector<8x32xf32>
    %c0_55 = arith.constant 0 : index
    %c0_56 = arith.constant 0 : index
    %101 = vector.load %arg12[%c0_55, %c0_56] : memref<1x32xf32, #tpu.memory_space<vmem>>, vector<1x32xf32>
    %102 = vector.shape_cast %101 : vector<1x32xf32> to vector<32xf32>
    %103 = vector.shape_cast %102 : vector<32xf32> to vector<1x32xf32>
    %104 = vector.broadcast %103 : vector<1x32xf32> to vector<8x32xf32>
    %105 = arith.addf %100, %104 : vector<8x32xf32>
    %c0_57 = arith.constant 0 : index
    %c0_58 = arith.constant 0 : index
    %c0_59 = arith.constant 0 : index
    %106 = vector.load %arg13[%c0_57, %c0_58, %c0_59] : memref<1x8x32xf32, #tpu.memory_space<vmem>>, vector<1x8x32xf32>
    %107 = vector.shape_cast %106 : vector<1x8x32xf32> to vector<8x32xf32>
    %108 = vector.shape_cast %105 : vector<8x32xf32> to vector<1x8x32xf32>
    tpu.vector_store %arg13[%c0_57, %c0_58, %c0_59], %108 {strides = array<i32>} : memref<1x8x32xf32, #tpu.memory_space<vmem>>, vector<1x8x32xf32>,
    return
  }
  func.func @transform_0(%arg0: i32, %arg1: i32) -> (i32, i32, i32) {
    %c0_i32 = arith.constant 0 : i32
    %c0_i32_0 = arith.constant 0 : i32
    return %arg0, %arg1, %c0_i32 : i32, i32, i32
  }
  func.func @transform_1(%arg0: i32, %arg1: i32) -> (i32, i32, i32, i32) {
    %c0_i32 = arith.constant 0 : i32
    %c0_i32_0 = arith.constant 0 : i32
    %c0_i32_1 = arith.constant 0 : i32
    return %arg0, %arg1, %c0_i32, %c0_i32_0 : i32, i32, i32, i32
  }
  func.func @transform_2(%arg0: i32, %arg1: i32) -> (i32, i32, i32, i32) {
    %c0_i32 = arith.constant 0 : i32
    %c0_i32_0 = arith.constant 0 : i32
    %c0_i32_1 = arith.constant 0 : i32
    %c0_i32_2 = arith.constant 0 : i32
    return %arg0, %c0_i32, %c0_i32_0, %c0_i32_1 : i32, i32, i32, i32
  }
  func.func @transform_3(%arg0: i32, %arg1: i32) -> (i32, i32, i32, i32) {
    %c0_i32 = arith.constant 0 : i32
    %c0_i32_0 = arith.constant 0 : i32
    %c0_i32_1 = arith.constant 0 : i32
    %c0_i32_2 = arith.constant 0 : i32
    return %arg0, %c0_i32, %c0_i32_0, %c0_i32_1 : i32, i32, i32, i32
  }
  func.func @transform_4(%arg0: i32, %arg1: i32) -> (i32, i32) {
    %c0_i32 = arith.constant 0 : i32
    %c0_i32_0 = arith.constant 0 : i32
    %c0_i32_1 = arith.constant 0 : i32
    return %c0_i32, %c0_i32_0 : i32, i32
  }
  func.func @transform_5(%arg0: i32, %arg1: i32) -> (i32, i32) {
    %c0_i32 = arith.constant 0 : i32
    %c0_i32_0 = arith.constant 0 : i32
    %c0_i32_1 = arith.constant 0 : i32
    return %c0_i32, %c0_i32_0 : i32, i32
  }
  func.func @transform_6(%arg0: i32, %arg1: i32) -> (i32, i32, i32) {
    %c0_i32 = arith.constant 0 : i32
    %c0_i32_0 = arith.constant 0 : i32
    %c0_i32_1 = arith.constant 0 : i32
    %c0_i32_2 = arith.constant 0 : i32
    return %c0_i32, %c0_i32_0, %c0_i32_1 : i32, i32, i32
  }
  func.func @transform_7(%arg0: i32, %arg1: i32) -> (i32, i32, i32) {
    %c0_i32 = arith.constant 0 : i32
    %c0_i32_0 = arith.constant 0 : i32
    %c0_i32_1 = arith.constant 0 : i32
    %c0_i32_2 = arith.constant 0 : i32
    return %c0_i32, %c0_i32_0, %c0_i32_1 : i32, i32, i32
  }
  func.func @transform_8(%arg0: i32, %arg1: i32) -> (i32, i32) {
    %c0_i32 = arith.constant 0 : i32
    %c0_i32_0 = arith.constant 0 : i32
    %c0_i32_1 = arith.constant 0 : i32
    return %c0_i32, %c0_i32_0 : i32, i32
  }
  func.func @transform_9(%arg0: i32, %arg1: i32) -> (i32, i32) {
    %c0_i32 = arith.constant 0 : i32
    %c0_i32_0 = arith.constant 0 : i32
    %c0_i32_1 = arith.constant 0 : i32
    return %c0_i32, %c0_i32_0 : i32, i32
  }
  func.func @transform_10(%arg0: i32, %arg1: i32) -> (i32, i32) {
    %c0_i32 = arith.constant 0 : i32
    %c0_i32_0 = arith.constant 0 : i32
    %c0_i32_1 = arith.constant 0 : i32
    return %c0_i32, %c0_i32_0 : i32, i32
  }
  func.func @transform_11(%arg0: i32, %arg1: i32) -> (i32, i32, i32) {
    %c0_i32 = arith.constant 0 : i32
    %c0_i32_0 = arith.constant 0 : i32
    return %arg0, %arg1, %c0_i32 : i32, i32, i32
  }
  func.func @transform_12(%arg0: i32, %arg1: i32) -> (i32, i32, i32, i32) {
    %c0_i32 = arith.constant 0 : i32
    %c0_i32_0 = arith.constant 0 : i32
    %c0_i32_1 = arith.constant 0 : i32
    return %arg0, %c0_i32, %arg1, %c0_i32_0 : i32, i32, i32, i32
  }
}

</mosaic_0001>

<bundles_post_ra>
// kernel: tpu_custom_call.1
= control target key start
LH: loop header
LB: loop body
LE: loop exit
PB: predicated region body
PF: predicated region fallthrough
CT: control target
= control target key end

     0   :  { %s3475_s0 = inlined_call_operand.vmem [shape: f32[2,8,32], index: 0, kind: input, shape index: {}]   ;;  %s3476_s1 = inlined_call_operand.hbm [shape: bf16[2,8,16,32], index: 1, kind: input, shape index: {}]   ;;  %s3477_s2 = inlined_call_operand.vmem [shape: bf16[2,4,8,16], index: 2, kind: input, shape index: {}]   ;;  %s3478_s3 = inlined_call_operand.vmem [shape: bf16[2,4,16,8], index: 3, kind: input, shape index: {}]   ;;  %s3479_s4 = inlined_call_operand.vmem [shape: bf16[32,32], index: 4, kind: input, shape index: {}]   ;;  %s3480_s5 = inlined_call_operand.vmem [shape: f32[1,32], index: 5, kind: input, shape index: {}]   ;;  %s3481_s6 = inlined_call_operand.vmem [shape: bf16[4,8,32], index: 6, kind: input, shape index: {}]   ;;  %s3482_s7 = inlined_call_operand.vmem [shape: bf16[4,8,32], index: 7, kind: input, shape index: {}]   ;;  %s3483_s8 = inlined_call_operand.vmem [shape: f32[1,32], index: 8, kind: input, shape index: {}]   ;;  %s3484_s9 = inlined_call_operand.vmem [shape: f32[1,32], index: 9, kind: input, shape index: {}]   ;;  %s3485_s10 = inlined_call_operand.vmem [shape: f32[1,32], index: 10, kind: input, shape index: {}]   ;;  %s3486_s11 = inlined_call_operand.hbm [shape: f32[2,8,32], index: 11, kind: output, shape index: {0}]   ;;  %s3487_s12 = inlined_call_operand.hbm [shape: f32[2,4,8,16], index: 12, kind: output, shape index: {1}]  }
   0x1   :  { %3492 = sst [smem:[#allocation15_spill]] %s3475_s0 }
   0x2   :  { %18 = vsyncpa [#allocation3], 0 }
   0x3   :  { %20 = vsyncpa [#allocation3 + $0x1], 0 }
   0x4   :  { %21 = vsyncpa [#allocation4], 0 }
   0x5   :  { %23 = vsyncpa [#allocation4 + $0x1], 0 }
   0x6   :  { %24 = vsyncpa [#allocation7], 0 }
   0x7   :  { %26 = vsyncpa [#allocation7 + $0x1], 0  ;;  %s2990_s21 = smov 0   ;;  %s2992_s22 = smov 0  }
   0x8   :  { %s2994_s23 = smov 0   ;;  %s2996_s24 = smov 0  }
   0x9   :  { %s2998_s25 = smov 0   ;;  %s3000_s26 = smov 0  }
   0xa LB: > { %3493 = sst [smem:[#allocation11_spill]] %s2889_s21  ;;  %s2377_s27 = sadd.s32 4294967295, %s2909_s26   ;;  %s2909_s26 = sphi %s3000_s26, %s32_s26   ;;  %s2905_s25 = sphi %s2998_s25, %s3510_s25   ;;  %s2901_s24 = sphi %s2996_s24, %s3509_s24   ;;  %s2897_s23 = sphi %s2994_s23, %s3513_s23   ;;  %s2893_s22 = sphi %s2992_s22, %s3512_s22   ;;  %s2889_s21 = sphi %s2990_s21, %s3511_s21  }
   0xb   : > { %3494 = sst [smem:[#allocation12_spill]] %s2905_s25  ;;  %s2378_s28 = sadd.s32 4294967294, %s2909_s26  }
   0xc   : > { %s44_s29 = sadd.s32 1, %s2905_s25  ;;  %s81_s30 = sadd.s32 1, %s2897_s23 }
   0xd   : > { %p46_p0 = scmp.ge.s32.totalorder %s44_s29, 2  ;;  %p88_p1 = scmp.ne.s32.totalorder %s2897_s23, %s2893_s22 }
   0xe   : > { %p89_p2 = scmp.eq.s32.totalorder %s2909_s26, 0  ;;  %p94_p3 = scmp.ne.s32.totalorder %s2893_s22, %s2889_s21 }
   0xf   : > { %s3515_s29 = smov (%p46_p0, %s44_s29), 0  ;;  %p95_p5 = scmp.eq.s32.totalorder %s2377_s27, 0 }
  0x10   : > { %3495 = sst [smem:[#allocation13_spill]] %s3515_s29  ;;  %p3031_p4 = por %p89_p2, %p88_p1 }
  0x11   : > { %s76_s14 = ssub.s32 %s2905_s25, %s3515_s29  ;;  %p319_p6 = scmp.eq.s32.totalorder %s2377_s27, 1 }
  0x12   : > { %p79_p7 = scmp.eq.s32.totalorder %s76_s14, 0  ;;  %p3037_p8 = por %p95_p5, %p94_p3 }
  0x13   : > { %p3041_p9 = por %p319_p6, %p88_p1  ;;  %p325_p10 = scmp.eq.s32.totalorder %s2378_s28, 1 }
  0x14   : > { %s3046_s17 = scalar_select %p79_p7, %s2897_s23, %s81_s30  }
  0x15   : > { %s3498_s16 = scalar_select %p3041_p9, 1, 0 }
  0x16   : > { %3499 = sst [smem:[#allocation14_spill]] %s3046_s17  ;;  %p3048_p11 = por %p325_p10, %p94_p3 }
  0x17   : > { %p2672_p13 = scmp.lt.s32.totalorder %s2909_s26, 2  ;;  %s404_s19 = sand.u32 1, %s2897_s23  }
  0x18   : > { %s3500_s18 = scalar_select %p3048_p11, 1, 0 }
  0x19   : > { %s2381_s20 = sshll.u32 %s404_s19, 6  ;;  %s2448_s27 = sshll.u32 %s2905_s25, 10 }
  0x1a   : > { %s3059_s21 = scalar_lea.hbm %s3476_s1, %s2448_s27  ;;  %s408_s28 = scalar_lea.vmem [#allocation2], %s2381_s20 }
  0x1b   : > { %s418_s30 = sshll.u32 %s408_s28, 4  ;;  %p3065_p0 = pnand %p2672_p13, %p3031_p4  ;;  %s3061_s30 = int_to_ptr.vmem [resolvable:$true] %s418_s30 }
  0x1c   : > { %s3070_s25 = scalar_lea.sflag [#allocation3], %s404_s19  ;;  %s2765_s29 = scalar_lea.hbm %s3059_s21, 1024 }
  0x1d   : > { %p2766_p2 = scmp.ne.s32.totalorder %s3059_s21, %s2765_s29  ;;  %p2767_p3 = pneg %p3065_p0 }
  0x1e   : > { %s2770_s13 = scalar_lea.hbm %s3476_s1, 2048  ;;  %p2771_p4 = scmp.lt.u32.totalorder %s3059_s21, %s3476_s1 }
  0x1f   : > { %p2768_p5 = pnand %p2767_p3, %p2766_p2  ;;  %p2772_p7 = scmp.lt.u32.totalorder %s2770_s13, %s2765_s29 }
  0x20   : > { %p2774_p13 = scmp.lt.u32.totalorder %s2765_s29, %s3059_s21 }
  0x21   : > { %p2769_p6 = pneg %p2768_p5  ;;  %p2773_p10 = por %p2772_p7, %p2771_p4 }
  0x23   : > { %p2775_p12 = por %p2774_p13, %p2773_p10 }
  0x25   : > { %p2776_p1 = pnand %p2775_p12, %p2769_p6 }
  0x27   : > { %2779 = shalt.err (!%p2776_p1)
}
  0x28   : > { %s2780_s19 = scalar_lea.vmem %s3061_s30, 1024  ;;  %s2911_s20 = smov [#allocation2]  }
  0x29   : > { %p2781_p2 = scmp.ne.s32.totalorder %s3061_s30, %s2780_s19  ;;  %s2785_s27 = sshll.u32 %s2911_s20, 4  ;;  %s2786_s27 = int_to_ptr.vmem [resolvable:$false] %s2785_s27 }
  0x2a   : > { %s2787_s14 = scalar_lea.vmem %s2786_s27, 2048  ;;  %p2788_p9 = scmp.lt.s32.totalorder %s3061_s30, %s2786_s27 }
  0x2b   : > { %p2783_p5 = pnand %p2781_p2, %p2767_p3  ;;  %p2789_p4 = scmp.lt.s32.totalorder %s2787_s14, %s2780_s19 }
  0x2d   : > { %p2784_p11 = pneg %p2783_p5  ;;  %p2790_p7 = por %p2789_p4, %p2788_p9 }
  0x2f   : > { %p2791_p10 = pnand %p2790_p7, %p2784_p11 }
  0x31   : > { %2794 = shalt.err (!%p2791_p10)
}
  0x32   : > { %s2912_s29 = smov 64   ;;  %s2913_s13 = smov 4  }
  0x33   : > { %2664 = dma.hbm_to_vmem [thread:$0]  (!%p3065_p0), %s3059_s21, 1024, %s3061_s30, %s3070_s25, %s2912_s29, %s2912_s29, %s2913_s13  }
  0x34   : > { %p442_p12 = scmp.lt.s32.totalorder %s2909_s26, 3  ;;  %p3502_p1 = scmp.ge.s32.totalorder %s2909_s26, 1 }
  0x36   : > { %p443_p3 = pnand %p3502_p1, %p442_p12 }
  0x37   : > { %s3102_s28 = sand.u32 (!%p443_p3), 1, %s2893_s22  }
  0x38   : > { %446 = sbr.rel (%p443_p3) target bundleno = 2003 (0x7d3), region = 64  ;;  %s2385_s19 = sshll.u32 (!%p443_p3), %s3102_s28, 6 }
  0x39   : > { %s449_s20 = scalar_lea.sflag (!%p443_p3), [#allocation3], %s3102_s28  ;;  %s3106_s27 = scalar_lea.vmem (!%p443_p3), [#allocation2], %s2385_s19 }
  0x3f   : > { %2876 = dma.done.wait (%p3037_p8), %s449_s20, 1024  }
  0x40   : > { %2878 = vsyncadd (%p3037_p8), %s449_s20, 4294966272  ;;  %p515_p9 = scmp.lt.s32.totalorder %s2901_s24, 1  ;;  %v2914_v0 = vmov 0.0   ;;  %vm2915_vm0 = vmmov 0   ;;  %s3503_s0 = sld [smem:[#allocation15_spill]]  ;;  %v2733_v1 = vld [vmem:[%s3479_s4] sm:$0xff]   ;;  %v646_v17 = vlaneseq }
  0x41   : > { %2503 = vmatprep.subr.bf16.mxu0 %v2914_v0  ;;  %2507 = vmatprep.mubr.msk.bf16.mxu0 %vm2915_vm0, %v2914_v0  ;;  %v2734_v2 = vld [vmem:[%s3479_s4 + $0x8] sm:$0xff]   ;;  %vm587_vm1 = vcmask 261120   ;;  %v2393_v5 = vld [vmem:[%s3480_s5] ss:$0 sm:$0xff]  ;;  %s2916_s29 = smov 104   ;;  %s2917_s13 = smov 120  }
  0x42   : > { %s3117_s21 = scalar_select %p515_p9, %s2901_s24, 1  ;;  %2511 = vmatprep.subr.bf16.mxu1 %v2914_v0  ;;  %2513 = vmatprep.mubr.msk.bf16.mxu1 %vm2915_vm0, %v2914_v0  ;;  %v781_v11 = vld [vmem:[%s3481_s6] sm:$0xf]  ;;  %vm789_vm2 = vcmask 1043456   ;;  %v783_v12 = vld [vmem:[%s3481_s6 + $0x8] sm:$0xf] }
  0x43   : > { %2504 = vmatpush3.bf16.msra.mxu0 %v2733_v1  ;;  %v791_v13 = vsel %vm789_vm2, %v781_v11, 0  ;;  %v883_v14 = vsel %vm789_vm2, %v783_v12, 0  ;;  %v2919_v15 = vmov 1983009808   ;;  %v2920_v18 = vmov 1934713408  }
  0x44   : > { %s2388_s25 = sshll.u32 %s3117_s21, 3  ;;  %s2450_s20 = sshll.u32 %s3117_s21, 5  ;;  %2505 = vmatprep.subr.bf16.mxu0 %v2914_v0  ;;  %2512 = vmatpush3.bf16.msra.mxu1 %v791_v13  ;;  %v644_v16 = vunpack.c.l.s4 %v2919_v15  ;;  %v676_v19 = vunpack.c.l.s4 %v2920_v18  ;;  %v647_v21 = vshrl.u32 %v646_v17, 7  ;;  %v782_v60 = vld [vmem:[%s3481_s6 + $0x4] sm:$0xf]  ;;  %vm785_vm3 = vcmask 64512  }
  0x45   : > { %s3141_s17 = scalar_lea.vmem %s3478_s3, %s2450_s20  ;;  %2517 = vmatprep.subr.bf16.mxu1 %v2914_v0  ;;  %v837_v1 = vsel %vm789_vm2, %v782_v60, 0  ;;  %v2736_v12 = vld [vmem:[%s3106_s27 + $0x8] sm:$0xff]   ;;  %s2449_s20 = sshll.u32 %s3117_s21, 4  ;;  %vm1699_vm4 = vcmask 130048  }
  0x46   : > { %s521_s30 = scalar_lea.vmem %s3503_s0, %s2388_s25  ;;  %v645_v20 = vunpack.c.0.s8 %v644_v16  ;;  %v677_v24 = vunpack.c.0.s8 %v676_v19  ;;  %v1107_v13 = vsel %vm587_vm1, %v2736_v12, 0  ;;  %p3504_p11 = scmp.ne.s32.totalorder %s3498_s16, 0 }
  0x47   : > { %v3133_v3 = vld [vmem:[%s521_s30] sm:$0xff]  ;;  %2506 = vmatpush3.bf16.msra.mxu0 %v2734_v2  ;;  %s2918_s30 = smov 112   ;;  %s2921_s15 = smov [#allocation6]  }
  0x48   : > { %v535_v4 = vpack.c.bf16 %v3133_v3, %v3133_v3  ;;  %2523 = vmatprep.subr.bf16.mxu0 %v2914_v0  ;;  %v3160_v25 = vsub.s32 %v645_v20, %v647_v21  ;;  %v3162_v31 = vsub.s32 %v677_v24, %v647_v21 }
  0x4a   : > { %2508 = vmatmul.mubr.msk.bf16.vlgmr.msra.gmra.mrb[0].mxu0 %vm587_vm1, %v535_v4 }
  0x4b   : > { %2525 = vmatprep.mubr.msk.bf16.mxu0 %vm2915_vm0, %v2914_v0  ;;  %2524 = vmatpush3.bf16.msra.mxu0 %v883_v14 }
  0x4c   : > { %2535 = vmatprep.subr.bf16.mxu0 %v2914_v0 }
 0x11d   : > { %v625_v6 = vpop.f32.mrb[0].mxu0 }
 0x11e   : > { %v626_v7 = vadd.f32 %v2393_v5, %v625_v6  ;;  %v2509_v8 = vpop.f32.mrb[1].mxu0  ;;  %v784_v5 = vld [vmem:[%s3481_s6 + $0xc] sm:$0xf] }
 0x11f   : > { %v628_v9 = vpop.f32.mrb[2].mxu0 }
 0x120   : > { %638 = vrot.lane.b32.xlu1 %v626_v7, %s2916_s29  ;;  %632 = vrot.lane.b32.xlu0 %v626_v7, %s2917_s13  ;;  %v2510_v10 = vpop.f32.mrb[3].mxu0 }
 0x121   : > { %v2735_v10 = vld [vmem:[%s3106_s27] sm:$0xff]  }
 0x122   : > { %v1056_v11 = vsel %vm587_vm1, %v2735_v10, 0 }
 0x124   : > { %635 = vrot.lane.b32.xlu0 %v626_v7, %s2918_s30  ;;  %s527_s30 = scalar_lea.vmem %s3477_s2, %s2449_s20  ;;  %s2191_s20 = scalar_lea.sflag [#allocation7], %s3102_s28 }
 0x125   : > { %v552_v12 = vld [vmem:[%s527_s30] sm:$0xf] }
 0x192   : > { %v639_v22 = vpop.permute.xlu1 %638  ;;  %v633_v23 = vpop.permute.xlu0 %632 }
 0x193   : > { %v657_v26 = vcombine.low %v633_v23, %v639_v22  ;;  %v658_v27 = vcombine.high %v633_v23, %v639_v22 }
 0x195   : > { %v665_v32 = vrot.slane %v657_v26, %v3160_v25  ;;  %v672_v33 = vrot.slane %v658_v27, %v3160_v25 }
 0x196   : > { %v636_v28 = vpop.permute.xlu0 %635 }
 0x197   : > { %v641_v29 = vcombine.low %v626_v7, %v636_v28  ;;  %v642_v30 = vcombine.high %v626_v7, %v636_v28  ;;  %v929_v7 = vsel %vm789_vm2, %v784_v5, 0 }
 0x199   : > { %v649_v34 = vrot.slane %v641_v29, %v3160_v25  ;;  %v656_v35 = vrot.slane %v642_v30, %v3160_v25 }
 0x19b   : > { %v673_v36 = vcombine.low %v649_v34, %v665_v32  ;;  %v674_v37 = vcombine.high %v649_v34, %v665_v32  ;;  %v689_v38 = vcombine.low %v656_v35, %v672_v33  ;;  %v690_v39 = vcombine.high %v656_v35, %v672_v33 }
 0x19d   : > { %v681_v40 = vrot.slane %v673_v36, %v3162_v31  ;;  %v688_v41 = vrot.slane %v674_v37, %v3162_v31  ;;  %v697_v42 = vrot.slane %v689_v38, %v3162_v31  ;;  %v704_v43 = vrot.slane %v690_v39, %v3162_v31 }
 0x19f   : > { %v709_v44 = vcombine.low %v681_v40, %v688_v41  ;;  %v2397_v45 = vcombine.high %v681_v40, %v688_v41  ;;  %v725_v46 = vcombine.low %v697_v42, %v704_v43  ;;  %v2398_v47 = vcombine.high %v697_v42, %v704_v43 }
 0x1a1   : > { %v716_v48 = vrot.slane %v709_v44, %v3160_v25  ;;  %v724_v49 = vrot.slane %v2397_v45, %v3160_v25  ;;  %v732_v50 = vrot.slane %v725_v46, %v3160_v25  ;;  %v740_v51 = vrot.slane %v2398_v47, %v3160_v25  ;;  %v2737_v44 = vld [vmem:[%s3106_s27 + $0x10] sm:$0xff]   ;;  %v2738_v46 = vld [vmem:[%s3106_s27 + $0x18] sm:$0xff]  }
 0x1a3   : > { %v742_v52 = vcombine.high %v716_v48, %v724_v49  ;;  %v758_v53 = vcombine.high %v732_v50, %v740_v51  ;;  %v741_v54 = vcombine.low %v716_v48, %v724_v49  ;;  %v757_v55 = vcombine.low %v732_v50, %v740_v51 }
 0x1a4   : > { %v1158_v49 = vsel %vm587_vm1, %v2737_v44, 0 }
 0x1a5   : > { %v749_v56 = vrot.slane %v741_v54, %v3162_v31  ;;  %v765_v57 = vrot.slane %v757_v55, %v3162_v31  ;;  %v756_v58 = vrot.slane %v742_v52, %v3162_v31  ;;  %v772_v59 = vrot.slane %v758_v53, %v3162_v31  ;;  %v2739_v53 = vld [vmem:[%s3106_s27 + $0x20] sm:$0xff]   ;;  %v2740_v55 = vld [vmem:[%s3106_s27 + $0x28] sm:$0xff]  }
 0x1a6   : > { %v1209_v52 = vsel %vm587_vm1, %v2738_v46, 0  ;;  %v1311_v60 = vsel %vm587_vm1, %v2740_v55, 0 }
 0x1a7   : > { %v773_v61 = vcombine.low %v749_v56, %v765_v57  ;;  %v775_v62 = vcombine.low %v756_v58, %v772_v59  ;;  %v774_v4 = vcombine.high %v749_v56, %v765_v57  ;;  %v776_v8 = vcombine.high %v756_v58, %v772_v59 }
 0x1a8   : > { %v1260_v57 = vsel %vm587_vm1, %v2739_v53, 0 }
 0x1a9   : > { %v3183_v63 = vpack.c.bf16 %v773_v61, %v773_v61  ;;  %v3186_v2 = vpack.c.bf16 %v775_v62, %v775_v62  ;;  %v3200_v6 = vpack.c.bf16 %v774_v4, %v774_v4  ;;  %v3208_v9 = vpack.c.bf16 %v776_v8, %v776_v8  ;;  %v2741_v61 = vld [vmem:[%s3106_s27 + $0x30] sm:$0xff]  }
 0x1aa   : > { %v1362_v5 = vsel %vm587_vm1, %v2741_v61, 0 }
 0x1ab   : > { %2514 = vmatmul.mubr.msk.bf16.vlgmr.msra.gmra.mrb[0].mxu1 %vm785_vm3, %v3183_v63  ;;  %2526 = vmatmul.mubr.msk.bf16.vlgmr.msra.gmra.mrb[4].mxu0 %vm785_vm3, %v3186_v2 }
 0x1ac   : > { %2518 = vmatpush3.bf16.msra.mxu1 %v837_v1  ;;  %2519 = vmatprep.mubr.msk.bf16.mxu1 %vm2915_vm0, %v2914_v0  ;;  %v2742_v1 = vld [vmem:[%s3106_s27 + $0x38] sm:$0xff]   ;;  %s2387_s27 = sshll.u32 %s3102_s28, 5 }
 0x1ad   : > { %2529 = vmatprep.subr.bf16.mxu1 %v2914_v0  ;;  %2537 = vmatprep.mubr.msk.bf16.mxu0 %vm2915_vm0, %v2914_v0  ;;  %v1413_v10 = vsel %vm587_vm1, %v2742_v1, 0  ;;  %s3324_s21 = scalar_lea.vmem [#allocation6], %s2387_s27 }
 0x1ae   : > { %2536 = vmatpush3.bf16.xpose.msra.mxu0 %v1056_v11  ;;  %s2219_s14 = sshll.u32 %s3324_s21, 4  ;;  %s3388_s14 = int_to_ptr.vmem [resolvable:$true] %s2219_s14 }
 0x1af   : > { %2547 = vmatprep.subr.bf16.mxu0 %v2914_v0  ;;  %s2795_s25 = scalar_lea.vmem %s3388_s14, 512 }
 0x1b0   : > { %p2796_p8 = scmp.ne.s32.totalorder %s3388_s14, %s2795_s25 }
 0x1b2   : > { %p2797_p0 = pnand %p2796_p8, %p3504_p11 }
 0x1b3   : > { %2520 = vmatmul.mubr.msk.bf16.vlgmr.msra.gmra.mrb[4].mxu1 %vm785_vm3, %v3200_v6 }
 0x1b4   : > { %2530 = vmatpush3.bf16.msra.mxu1 %v929_v7  ;;  %2531 = vmatprep.mubr.msk.bf16.mxu1 %vm2915_vm0, %v2914_v0  ;;  %p2798_p6 = pneg %p2797_p0 }
 0x1b5   : > { %2541 = vmatprep.subr.bf16.mxu1 %v2914_v0 }
 0x1bb   : > { %2532 = vmatmul.mubr.msk.bf16.vlgmr.msra.gmra.mrb[8].mxu1 %vm785_vm3, %v3208_v9 }
 0x1bc   : > { %2543 = vmatprep.mubr.msk.bf16.mxu1 %vm2915_vm0, %v2914_v0 }
 0x1bd   : > { %2542 = vmatpush3.bf16.xpose.msra.mxu1 %v1107_v13  ;;  %v553_v13 = vld [vmem:[%s527_s30 + $0x4] sm:$0xf] }
 0x1be   : > { %2553 = vmatprep.subr.bf16.mxu1 %v2914_v0 }
 0x27e   : > { %v827_v14 = vpop.f32.mrb[0].mxu1  ;;  %v919_v15 = vpop.f32.mrb[4].mxu0 }
 0x27f   : > { %v971_v16 = vcombine.low %v827_v14, %v919_v15  ;;  %v972_v17 = vcombine.high %v827_v14, %v919_v15  ;;  %v2515_v18 = vpop.f32.mrb[1].mxu1  ;;  %v2527_v19 = vpop.f32.mrb[5].mxu0  ;;  %v1524_v15 = vsel %vm789_vm2, %v552_v12, 0 }
 0x280   : > { %v830_v20 = vpop.f32.mrb[2].mxu1  ;;  %v922_v21 = vpop.f32.mrb[6].mxu0  ;;  %v554_v18 = vld [vmem:[%s527_s30 + $0x8] sm:$0xf]  ;;  %v555_v19 = vld [vmem:[%s527_s30 + $0xc] sm:$0xf] }
 0x281   : > { %v2516_v22 = vpop.f32.mrb[3].mxu1  ;;  %v2528_v23 = vpop.f32.mrb[7].mxu0  ;;  %v979_v35 = vrot.slane %v971_v16, %v3160_v25  ;;  %v986_v36 = vrot.slane %v972_v17, %v3160_v25  ;;  %v1567_v17 = vsel %vm789_vm2, %v553_v13, 0  ;;  %v1610_v20 = vsel %vm789_vm2, %v554_v18, 0  ;;  %s2799_s30 = sshll.u32 %s2921_s15, 4  ;;  %s2800_s30 = int_to_ptr.vmem [resolvable:$false] %s2799_s30 }
 0x282   : > { %v1653_v21 = vsel %vm789_vm2, %v555_v19, 0  ;;  %p2802_p13 = scmp.lt.s32.totalorder %s3388_s14, %s2800_s30 }
 0x286   : > { %v873_v24 = vpop.f32.mrb[4].mxu1 }
 0x287   : > { %v2521_v26 = vpop.f32.mrb[5].mxu1 }
 0x288   : > { %v876_v27 = vpop.f32.mrb[6].mxu1 }
 0x289   : > { %v2522_v28 = vpop.f32.mrb[7].mxu1 }
 0x28e   : > { %v965_v29 = vpop.f32.mrb[8].mxu1 }
 0x28f   : > { %v987_v30 = vcombine.low %v873_v24, %v965_v29  ;;  %v988_v32 = vcombine.high %v873_v24, %v965_v29  ;;  %v2533_v33 = vpop.f32.mrb[9].mxu1 }
 0x290   : > { %v968_v34 = vpop.f32.mrb[10].mxu1 }
 0x291   : > { %v995_v37 = vrot.slane %v987_v30, %v3160_v25  ;;  %v1002_v38 = vrot.slane %v988_v32, %v3160_v25  ;;  %v2534_v39 = vpop.f32.mrb[11].mxu1 }
 0x293   : > { %v1003_v40 = vcombine.low %v979_v35, %v995_v37  ;;  %v1004_v41 = vcombine.high %v979_v35, %v995_v37  ;;  %v1019_v42 = vcombine.low %v986_v36, %v1002_v38  ;;  %v1020_v43 = vcombine.high %v986_v36, %v1002_v38 }
 0x295   : > { %v1011_v45 = vrot.slane %v1003_v40, %v3162_v31  ;;  %v1018_v50 = vrot.slane %v1004_v41, %v3162_v31  ;;  %v1027_v58 = vrot.slane %v1019_v42, %v3162_v31  ;;  %v1034_v7 = vrot.slane %v1020_v43, %v3162_v31 }
 0x297   : > { %v1035_v47 = vcombine.high %v1011_v45, %v2914_v0  ;;  %v1039_v48 = vpack.c.bf16 %v1011_v45, %v1011_v45  ;;  %v1036_v54 = vcombine.high %v1018_v50, %v2914_v0  ;;  %v1041_v56 = vpack.c.bf16 %v1018_v50, %v1018_v50 }
 0x298   : > { %v1037_v62 = vcombine.high %v1027_v58, %v2914_v0  ;;  %v1043_v4 = vpack.c.bf16 %v1027_v58, %v1027_v58  ;;  %v1038_v11 = vcombine.high %v1034_v7, %v2914_v0  ;;  %v1045_v14 = vpack.c.bf16 %v1034_v7, %v1034_v7 }
 0x299   : > { %v1040_v51 = vpack.c.bf16 %v1035_v47, %v1035_v47  ;;  %2538 = vmatmul.mubr.msk.bf16.vlgmr.msra.gmra.mrb[8].mxu0 %vm587_vm1, %v1039_v48  ;;  %v1042_v59 = vpack.c.bf16 %v1036_v54, %v1036_v54 }
 0x29a   : > { %2548 = vmatpush3.bf16.xpose.msra.mxu0 %v1158_v49  ;;  %2549 = vmatprep.mubr.msk.bf16.mxu0 %vm2915_vm0, %v2914_v0  ;;  %v1044_v8 = vpack.c.bf16 %v1037_v62, %v1037_v62  ;;  %v1046_v16 = vpack.c.bf16 %v1038_v11, %v1038_v11 }
 0x29b   : > { %2544 = vmatmul.mubr.msk.bf16.vlgmr.msra.gmra.mrb[12].mxu1 %vm587_vm1, %v1040_v51  ;;  %2559 = vmatprep.subr.bf16.mxu0 %v2914_v0 }
 0x29c   : > { %2554 = vmatpush3.bf16.xpose.msra.mxu1 %v1209_v52  ;;  %2555 = vmatprep.mubr.msk.bf16.mxu1 %vm2915_vm0, %v2914_v0 }
 0x29d   : > { %2565 = vmatprep.subr.bf16.mxu1 %v2914_v0 }
 0x2a1   : > { %2550 = vmatmul.mubr.msk.bf16.vlgmr.msra.gmra.mrb[12].mxu0 %vm587_vm1, %v1041_v56 }
 0x2a2   : > { %2560 = vmatpush3.bf16.xpose.msra.mxu0 %v1260_v57  ;;  %2561 = vmatprep.mubr.msk.bf16.mxu0 %vm2915_vm0, %v2914_v0 }
 0x2a3   : > { %2556 = vmatmul.mubr.msk.bf16.vlgmr.msra.gmra.mrb[16].mxu1 %vm587_vm1, %v1042_v59  ;;  %2571 = vmatprep.subr.bf16.mxu0 %v2914_v0 }
 0x2a4   : > { %2566 = vmatpush3.bf16.xpose.msra.mxu1 %v1311_v60  ;;  %2567 = vmatprep.mubr.msk.bf16.mxu1 %vm2915_vm0, %v2914_v0 }
 0x2a5   : > { %2577 = vmatprep.subr.bf16.mxu1 %v2914_v0 }
 0x2a9   : > { %2562 = vmatmul.mubr.msk.bf16.vlgmr.msra.gmra.mrb[16].mxu0 %vm587_vm1, %v1043_v4 }
 0x2aa   : > { %2572 = vmatpush3.bf16.xpose.msra.mxu0 %v1362_v5  ;;  %2573 = vmatprep.mubr.msk.bf16.mxu0 %vm2915_vm0, %v2914_v0 }
 0x2ab   : > { %2568 = vmatmul.mubr.msk.bf16.vlgmr.msra.gmra.mrb[20].mxu1 %vm587_vm1, %v1044_v8  ;;  %2583 = vmatprep.subr.bf16.mxu0 %v2914_v0 }
 0x2ac   : > { %2578 = vmatpush3.bf16.xpose.msra.mxu1 %v1413_v10  ;;  %2579 = vmatprep.mubr.msk.bf16.mxu1 %vm2915_vm0, %v2914_v0 }
 0x2ad   : > { %2589 = vmatprep.subr.bf16.mxu1 %v2914_v0 }
 0x2b1   : > { %2574 = vmatmul.mubr.msk.bf16.vlgmr.msra.gmra.mrb[20].mxu0 %vm587_vm1, %v1045_v14 }
 0x2b2   : > { %2584 = vmatpush3.bf16.msra.mxu0 %v1524_v15  ;;  %2585 = vmatprep.mubr.msk.bf16.mxu0 %vm2915_vm0, %v2914_v0 }
 0x2b3   : > { %2580 = vmatmul.mubr.msk.bf16.vlgmr.msra.gmra.mrb[24].mxu1 %vm587_vm1, %v1046_v16  ;;  %2595 = vmatprep.subr.bf16.mxu0 %v2914_v0 }
 0x2b4   : > { %2590 = vmatpush3.bf16.msra.mxu1 %v1567_v17  ;;  %2591 = vmatprep.mubr.msk.bf16.mxu1 %vm2915_vm0, %v2914_v0 }
 0x2b5   : > { %2601 = vmatprep.subr.bf16.mxu1 %v2914_v0 }
 0x2b9   : > { %2586 = vmatmul.mubr.msk.bf16.vlgmr.msra.gmra.mrb[24].mxu0 %vm785_vm3, %v3183_v63 }
 0x2ba   : > { %2596 = vmatpush3.bf16.msra.mxu0 %v1610_v20  ;;  %2597 = vmatprep.mubr.msk.bf16.mxu0 %vm2915_vm0, %v2914_v0 }
 0x2bb   : > { %2592 = vmatmul.mubr.msk.bf16.vlgmr.msra.gmra.mrb[28].mxu1 %vm785_vm3, %v3200_v6  ;;  %2607 = vmatprep.subr.bf16.mxu0 %v2914_v0 }
 0x2bc   : > { %2602 = vmatpush3.bf16.msra.mxu1 %v1653_v21  ;;  %2603 = vmatprep.mubr.msk.bf16.mxu1 %vm2915_vm0, %v2914_v0 }
 0x2bd   : > { %2613 = vmatprep.subr.bf16.mxu1 %v2914_v0 }
 0x2c1   : > { %2598 = vmatmul.mubr.msk.bf16.vlgmr.msra.gmra.mrb[28].mxu0 %vm785_vm3, %v3186_v2 }
 0x2c2   : > { %2609 = vmatprep.mubr.msk.bf16.mxu0 %vm2915_vm0, %v2914_v0 }
 0x2c3   : > { %2604 = vmatmul.mubr.msk.bf16.vlgmr.msra.gmra.mrb[32].mxu1 %vm785_vm3, %v3208_v9 }
 0x2c4   : > { %2615 = vmatprep.mubr.msk.bf16.mxu1 %vm2915_vm0, %v2914_v0 }
 0x36c   : > { %v1092_v63 = vpop.f32.mrb[8].mxu0 }
 0x36d   : > { %v2539_v6 = vpop.f32.mrb[9].mxu0 }
 0x36e   : > { %v1143_v22 = vpop.f32.mrb[12].mxu1  ;;  %v1095_v23 = vpop.f32.mrb[10].mxu0 }
 0x36f   : > { %v2545_v24 = vpop.f32.mrb[13].mxu1  ;;  %v2540_v26 = vpop.f32.mrb[11].mxu0 }
 0x370   : > { %v1146_v27 = vpop.f32.mrb[14].mxu1 }
 0x371   : > { %v2546_v28 = vpop.f32.mrb[15].mxu1 }
 0x374   : > { %v1194_v29 = vpop.f32.mrb[12].mxu0 }
 0x375   : > { %v1455_v30 = vcombine.low %v1092_v63, %v1194_v29  ;;  %v2551_v2 = vpop.f32.mrb[13].mxu0 }
 0x376   : > { %v1245_v32 = vpop.f32.mrb[16].mxu1  ;;  %v1197_v33 = vpop.f32.mrb[14].mxu0 }
 0x377   : > { %v1463_v9 = vcombine.low %v1143_v22, %v1245_v32  ;;  %v2557_v34 = vpop.f32.mrb[17].mxu1  ;;  %v2552_v35 = vpop.f32.mrb[15].mxu0  ;;  %v1462_v37 = vrot.slane %v1455_v30, %v3160_v25 }
 0x378   : > { %v1248_v36 = vpop.f32.mrb[18].mxu1 }
 0x379   : > { %v1470_v38 = vrot.slane %v1463_v9, %v3160_v25  ;;  %v2558_v39 = vpop.f32.mrb[19].mxu1 }
 0x37b   : > { %v1487_v40 = vcombine.low %v1462_v37, %v1470_v38  ;;  %v1488_v41 = vcombine.high %v1462_v37, %v1470_v38 }
 0x37c   : > { %v1296_v42 = vpop.f32.mrb[16].mxu0 }
 0x37d   : > { %v2563_v43 = vpop.f32.mrb[17].mxu0  ;;  %v1495_v4 = vrot.slane %v1487_v40, %v3162_v31  ;;  %v1502_v8 = vrot.slane %v1488_v41, %v3162_v31 }
 0x37e   : > { %v1347_v44 = vpop.f32.mrb[20].mxu1  ;;  %v1299_v45 = vpop.f32.mrb[18].mxu0 }
 0x37f   : > { %v2569_v46 = vpop.f32.mrb[21].mxu1  ;;  %v2564_v47 = vpop.f32.mrb[19].mxu0 }
 0x380   : > { %v1350_v48 = vpop.f32.mrb[22].mxu1 }
 0x381   : > { %v2570_v49 = vpop.f32.mrb[23].mxu1 }
 0x384   : > { %v1398_v50 = vpop.f32.mrb[20].mxu0 }
 0x385   : > { %v1471_v51 = vcombine.low %v1296_v42, %v1398_v50  ;;  %v2575_v52 = vpop.f32.mrb[21].mxu0 }
 0x386   : > { %v1449_v53 = vpop.f32.mrb[24].mxu1  ;;  %v1401_v54 = vpop.f32.mrb[22].mxu0 }
 0x387   : > { %v1479_v55 = vcombine.low %v1347_v44, %v1449_v53  ;;  %v2581_v56 = vpop.f32.mrb[25].mxu1  ;;  %v2576_v57 = vpop.f32.mrb[23].mxu0  ;;  %v1478_v59 = vrot.slane %v1471_v51, %v3160_v25 }
 0x388   : > { %v1452_v58 = vpop.f32.mrb[26].mxu1 }
 0x389   : > { %v1486_v60 = vrot.slane %v1479_v55, %v3160_v25  ;;  %v2582_v61 = vpop.f32.mrb[27].mxu1  ;;  %v2743_v58 = vld [vmem:[%s3141_s17] sm:$0xff]  }
 0x38a   : > { %2608 = vmatpush3.bf16.msra.mxu0 %v2743_v58 }
 0x38b   : > { %v1503_v62 = vcombine.low %v1478_v59, %v1486_v60  ;;  %v1504_v1 = vcombine.high %v1478_v59, %v1486_v60  ;;  %v2744_v59 = vld [vmem:[%s3141_s17 + $0x8] sm:$0xff]   ;;  %2619 = vmatprep.subr.bf16.mxu0 %v2914_v0 }
 0x38c   : > { %v1560_v7 = vpop.f32.mrb[24].mxu0  ;;  %2614 = vmatpush3.bf16.msra.mxu1 %v2744_v59 }
 0x38d   : > { %v1511_v5 = vrot.slane %v1503_v62, %v3162_v31  ;;  %v1518_v10 = vrot.slane %v1504_v1, %v3162_v31  ;;  %v2587_v11 = vpop.f32.mrb[25].mxu0  ;;  %2625 = vmatprep.subr.bf16.mxu1 %v2914_v0 }
 0x38e   : > { %v1603_v12 = vpop.f32.mrb[28].mxu1  ;;  %v1563_v14 = vpop.f32.mrb[26].mxu0 }
 0x38f   : > { %v1519_v13 = vcombine.low %v1495_v4, %v1511_v5  ;;  %v1520_v15 = vcombine.high %v1495_v4, %v1511_v5  ;;  %v2593_v16 = vpop.f32.mrb[29].mxu1  ;;  %v1521_v17 = vcombine.low %v1502_v8, %v1518_v10  ;;  %v1522_v25 = vcombine.high %v1502_v8, %v1518_v10  ;;  %v2588_v18 = vpop.f32.mrb[27].mxu0  ;;  %v2746_v10 = vld [vmem:[%s3141_s17 + $0x18] sm:$0xff]  }
 0x390   : > { %v1606_v19 = vpop.f32.mrb[30].mxu1  ;;  %v2431_v18 = vld [vmem:[%s3482_s7 + $0x4] sm:$0xf] }
 0x391   : > { %v1561_v20 = vadd.f32 %v1560_v7, %v1519_v13  ;;  %v1604_v21 = vadd.f32 %v1603_v12, %v1520_v15  ;;  %v2594_v63 = vpop.f32.mrb[31].mxu1  ;;  %v2745_v12 = vld [vmem:[%s3141_s17 + $0x10] sm:$0xff]   ;;  %s2451_s17 = sshll.u32 %s2901_s24, 9 }
 0x392   : > { %v1957_v63 = vsel %vm789_vm2, %v2431_v18, 0  ;;  %s3386_s19 = scalar_lea.hbm %s3487_s12, %s2451_s17 }
 0x393   : > { %v1695_v6 = vmul.f32 0.35355338, %v1561_v20  ;;  %v1696_v22 = vmul.f32 0.35355338, %v1604_v21 }
 0x394   : > { %v1646_v23 = vpop.f32.mrb[28].mxu0 }
 0x395   : > { %v1703_v24 = vsel %vm1699_vm4, %v1696_v22, -inf  ;;  %v1700_v31 = vsel %vm1699_vm4, %v1695_v6, -inf  ;;  %v1647_v26 = vadd.f32 %v1646_v23, %v1521_v17  ;;  %v2599_v27 = vpop.f32.mrb[29].mxu0 }
 0x396   : > { %v1689_v28 = vpop.f32.mrb[32].mxu1  ;;  %1704 = vmax.xlane.f32.xlu0 %v1703_v24  ;;  %1701 = vmax.xlane.f32.xlu1 %v1700_v31  ;;  %v1649_v30 = vpop.f32.mrb[30].mxu0 }
 0x397   : > { %v1690_v29 = vadd.f32 %v1689_v28, %v1522_v25  ;;  %v2605_v2 = vpop.f32.mrb[33].mxu1  ;;  %v1697_v32 = vmul.f32 0.35355338, %v1647_v26  ;;  %v2600_v33 = vpop.f32.mrb[31].mxu0  ;;  %v1949_v25 = vld [vmem:[%s3482_s7] sm:$0xf] }
 0x398   : > { %v1692_v9 = vpop.f32.mrb[34].mxu1  ;;  %v2003_v20 = vsel %vm789_vm2, %v1949_v25, 0 }
 0x399   : > { %v1698_v34 = vmul.f32 0.35355338, %v1690_v29  ;;  %v2606_v35 = vpop.f32.mrb[35].mxu1  ;;  %v1706_v36 = vsel %vm1699_vm4, %v1697_v32, -inf }
 0x39a   : > { %1707 = vmax.xlane.f32.xlu0 %v1706_v36 }
 0x39b   : > { %v1709_v37 = vsel %vm1699_vm4, %v1698_v34, -inf }
 0x39c   : > { %1710 = vmax.xlane.f32.xlu1 %v1709_v37 }
 0x423   : > { %v1705_v38 = vpop.xlane.xlu0 %1704  ;;  %v1702_v39 = vpop.xlane.xlu1 %1701 }
 0x424   : > { %v1713_v40 = vsub.f32 %v1696_v22, %v1705_v38  ;;  %v1712_v41 = vsub.f32 %v1695_v6, %v1702_v39  ;;  %v2434_v6 = vld [vmem:[%s3482_s7 + $0x8] sm:$0xf]  ;;  %v2436_v22 = vld [vmem:[%s3482_s7 + $0xc] sm:$0xf] }
 0x425   : > { %v2052_v27 = vsel %vm789_vm2, %v2434_v6, 0  ;;  %v2102_v2 = vsel %vm789_vm2, %v2436_v22, 0 }
 0x426   : > { %v1718_v42 = vmul.f32 1.442695, %v1713_v40  ;;  %v1716_v43 = vmul.f32 1.442695, %v1712_v41 }
 0x427   : > { %v1708_v44 = vpop.xlane.xlu0 %1707 }
 0x428   : > { %2747 = vpow2.f32 %v1718_v42  ;;  %v1714_v45 = vsub.f32 %v1697_v32, %v1708_v44 }
 0x429   : > { %2749 = vpow2.f32 %v1716_v43  ;;  %v1711_v46 = vpop.xlane.xlu1 %1710 }
 0x42a   : > { %v1715_v47 = vsub.f32 %v1698_v34, %v1711_v46  ;;  %v1720_v48 = vmul.f32 1.442695, %v1714_v45 }
 0x42c   : > { %v1722_v49 = vmul.f32 1.442695, %v1715_v47  ;;  %2751 = vpow2.f32 %v1720_v48 }
 0x42e   : > { %2753 = vpow2.f32 %v1722_v49 }
 0x432   : > { %v2748_v50 = vpop.eup %2747 }
 0x433   : > { %v2750_v51 = vpop.eup %2749  ;;  %v1727_v52 = vsel %vm1699_vm4, %v2748_v50, 0.0 }
 0x434   : > { %1728 = vadd.xlane.f32.xlu1 %v1727_v52  ;;  %v1724_v53 = vsel %vm1699_vm4, %v2750_v51, 0.0 }
 0x435   : > { %1725 = vadd.xlane.f32.xlu0 %v1724_v53 }
 0x436   : > { %v2752_v54 = vpop.eup %2751 }
 0x437   : > { %v1730_v56 = vsel %vm1699_vm4, %v2752_v54, 0.0 }
 0x438   : > { %v2754_v55 = vpop.eup %2753 }
 0x439   : > { %1731 = vadd.xlane.f32.xlu0 %v1730_v56  ;;  %v1733_v57 = vsel %vm1699_vm4, %v2754_v55, 0.0 }
 0x43a   : > { %1734 = vadd.xlane.f32.xlu1 %v1733_v57  ;;  %v2438_v57 = vld [vmem:[%s3483_s8] ss:$0 sm:$0xff] }
 0x4c1   : > { %v1729_v60 = vpop.xlane.xlu1 %1728 }
 0x4c2   : > { %2755 = vrcp.f32 %v1729_v60  ;;  %v1726_v61 = vpop.xlane.xlu0 %1725 }
 0x4c3   : > { %2757 = vrcp.f32 %v1726_v61 }
 0x4c6   : > { %v1732_v62 = vpop.xlane.xlu0 %1731 }
 0x4c7   : > { %2759 = vrcp.f32 %v1732_v62  ;;  %v1735_v1 = vpop.xlane.xlu1 %1734 }
 0x4c8   : > { %2761 = vrcp.f32 %v1735_v1 }
 0x4cc   : > { %v2756_v4 = vpop.eup %2755 }
 0x4cd   : > { %v2758_v5 = vpop.eup %2757  ;;  %v1739_v7 = vmul.f32 %v2756_v4, %v2748_v50 }
 0x4ce   : > { %v1737_v8 = vmul.f32 %v2758_v5, %v2750_v51 }
 0x4cf   : > { %1745 = vst.msk [vmem:[%s3324_s21 + $0x8] sm:$0xff] %vm1699_vm4, %v1739_v7  ;;  %v1749_v11 = vpack.c.bf16 %v1739_v7, %v1739_v7 }
 0x4d0   : > { %1744 = vst.msk [vmem:[%s3324_s21] sm:$0xff] %vm1699_vm4, %v1737_v8  ;;  %v1748_v13 = vpack.c.bf16 %v1737_v8, %v1737_v8 }
 0x4d1   : > { %v2760_v14 = vpop.eup %2759  ;;  %2616 = vmatmul.mubr.msk.bf16.vlgmr.msra.gmra.mrb[36].mxu1 %vm1699_vm4, %v1749_v11 }
 0x4d2   : > { %v2762_v15 = vpop.eup %2761  ;;  %v1741_v16 = vmul.f32 %v2760_v14, %v2752_v54  ;;  %2610 = vmatmul.mubr.msk.bf16.vlgmr.msra.gmra.mrb[32].mxu0 %vm1699_vm4, %v1748_v13  ;;  %2626 = vmatpush3.bf16.msra.mxu1 %v2746_v10 }
 0x4d3   : > { %v1743_v17 = vmul.f32 %v2762_v15, %v2754_v55  ;;  %2620 = vmatpush3.bf16.msra.mxu0 %v2745_v12  ;;  %2621 = vmatprep.mubr.msk.bf16.mxu0 %vm2915_vm0, %v2914_v0 }
 0x4d4   : > { %1746 = vst.msk [vmem:[%s3324_s21 + $0x10] sm:$0xff] %vm1699_vm4, %v1741_v16  ;;  %2627 = vmatprep.mubr.msk.bf16.mxu1 %vm2915_vm0, %v2914_v0  ;;  %2631 = vmatprep.subr.bf16.mxu0 %v2914_v0  ;;  %v1750_v21 = vpack.c.bf16 %v1741_v16, %v1741_v16 }
 0x4d5   : > { %1747 = vst.msk [vmem:[%s3324_s21 + $0x18] sm:$0xff] %vm1699_vm4, %v1743_v17  ;;  %2637 = vmatprep.subr.bf16.mxu1 %v2914_v0  ;;  %v1751_v19 = vpack.c.bf16 %v1743_v17, %v1743_v17  ;;  %s2801_s21 = scalar_lea.vmem %s2800_s30, 1024 }
 0x4d6   : > { %p2803_p2 = scmp.lt.s32.totalorder %s2801_s21, %s2795_s25 }
 0x4d8   : > { %p2804_p5 = por %p2803_p2, %p2802_p13 }
 0x4d9   : > { %2628 = vmatmul.mubr.msk.bf16.vlgmr.msra.gmra.mrb[40].mxu1 %vm1699_vm4, %v1751_v19 }
 0x4da   : > { %2622 = vmatmul.mubr.msk.bf16.vlgmr.msra.gmra.mrb[36].mxu0 %vm1699_vm4, %v1750_v21  ;;  %2638 = vmatpush3.bf16.msra.mxu1 %v2003_v20  ;;  %p2805_p4 = pnand %p2804_p5, %p2798_p6 }
 0x4db   : > { %2632 = vmatpush3.bf16.msra.mxu0 %v1957_v63  ;;  %2633 = vmatprep.mubr.msk.bf16.mxu0 %vm2915_vm0, %v2914_v0 }
 0x4dc   : > { %2639 = vmatprep.mubr.msk.bf16.mxu1 %vm2915_vm0, %v2914_v0  ;;  %2643 = vmatprep.subr.bf16.mxu0 %v2914_v0 }
 0x4dd   : > { %2649 = vmatprep.subr.bf16.mxu1 %v2914_v0 }
 0x5a4   : > { %v1844_v23 = vpop.f32.mrb[36].mxu1 }
 0x5a5   : > { %v1795_v24 = vpop.f32.mrb[32].mxu0  ;;  %v1950_v31 = vpack.c.bf16 %v1844_v23, %v1844_v23  ;;  %v2617_v26 = vpop.f32.mrb[37].mxu1 }
 0x5a6   : > { %v1948_v28 = vpack.c.bf16 %v1795_v24, %v1795_v24  ;;  %v2611_v29 = vpop.f32.mrb[33].mxu0  ;;  %v1847_v30 = vpop.f32.mrb[38].mxu1 }
 0x5a7   : > { %v1798_v32 = vpop.f32.mrb[34].mxu0  ;;  %v2618_v33 = vpop.f32.mrb[39].mxu1  ;;  %2634 = vmatmul.mubr.msk.bf16.vlgmr.msra.gmra.mrb[40].mxu0 %vm785_vm3, %v1950_v31 }
 0x5a8   : > { %v2612_v9 = vpop.f32.mrb[35].mxu0  ;;  %2640 = vmatmul.mubr.msk.bf16.vlgmr.msra.gmra.mrb[44].mxu1 %vm785_vm3, %v1948_v28  ;;  %2644 = vmatpush3.bf16.msra.mxu0 %v2052_v27 }
 0x5a9   : > { %2650 = vmatpush3.bf16.msra.mxu1 %v2102_v2  ;;  %2645 = vmatprep.mubr.msk.bf16.mxu0 %vm2915_vm0, %v2914_v0 }
 0x5aa   : > { %2651 = vmatprep.mubr.msk.bf16.mxu1 %vm2915_vm0, %v2914_v0 }
 0x5ac   : > { %v1942_v34 = vpop.f32.mrb[40].mxu1 }
 0x5ad   : > { %v1893_v35 = vpop.f32.mrb[36].mxu0  ;;  %v2095_v36 = vpack.c.bf16 %v1942_v34, %v1942_v34  ;;  %v2629_v37 = vpop.f32.mrb[41].mxu1 }
 0x5ae   : > { %v2045_v38 = vpack.c.bf16 %v1893_v35, %v1893_v35  ;;  %v2623_v39 = vpop.f32.mrb[37].mxu0  ;;  %v1945_v40 = vpop.f32.mrb[42].mxu1 }
 0x5af   : > { %v1896_v41 = vpop.f32.mrb[38].mxu0  ;;  %v2630_v42 = vpop.f32.mrb[43].mxu1 }
 0x5b0   : > { %v2624_v43 = vpop.f32.mrb[39].mxu0  ;;  %2646 = vmatmul.mubr.msk.bf16.vlgmr.msra.gmra.mrb[44].mxu0 %vm785_vm3, %v2045_v38  ;;  %2652 = vmatmul.mubr.msk.bf16.vlgmr.msra.gmra.mrb[48].mxu1 %vm785_vm3, %v2095_v36 }
 0x67a   : > { %v1993_v44 = vpop.f32.mrb[40].mxu0 }
 0x67b   : > { %v2039_v45 = vpop.f32.mrb[44].mxu1  ;;  %v2635_v46 = vpop.f32.mrb[41].mxu0 }
 0x67c   : > { %v2040_v47 = vadd.f32 %v2039_v45, %v1993_v44  ;;  %v2641_v48 = vpop.f32.mrb[45].mxu1  ;;  %v1996_v0 = vpop.f32.mrb[42].mxu0 }
 0x67d   : > { %v2042_v49 = vpop.f32.mrb[46].mxu1  ;;  %v2636_v50 = vpop.f32.mrb[43].mxu0 }
 0x67e   : > { %v2642_v51 = vpop.f32.mrb[47].mxu1 }
 0x683   : > { %v2088_v52 = vpop.f32.mrb[44].mxu0  ;;  %v2138_v53 = vpop.f32.mrb[48].mxu1 }
 0x684   : > { %v2094_v54 = vadd.f32 %v2088_v52, %v2040_v47  ;;  %v2647_v55 = vpop.f32.mrb[45].mxu0  ;;  %v2653_v56 = vpop.f32.mrb[49].mxu1 }
 0x685   : > { %v2091_v58 = vpop.f32.mrb[46].mxu0  ;;  %v2141_v59 = vpop.f32.mrb[50].mxu1 }
 0x686   : > { %v2144_v60 = vadd.f32 %v2138_v53, %v2094_v54  ;;  %v2648_v61 = vpop.f32.mrb[47].mxu0  ;;  %v2654_v62 = vpop.f32.mrb[51].mxu1 }
 0x688   : > { %v2152_v1 = vadd.f32 %v2438_v57, %v2144_v60 }
 0x68a   : > { %v2153_v4 = vadd.f32 %v2152_v1, %v3133_v3 }
 0x68c   : > { %v2154_v5 = vsel %vm587_vm1, %v2153_v4, 0.0 }
 0x68d   : > { %2155 = vadd.xlane.f32.xlu0 %v2154_v5 }
 0x71a   : > { %v2156_v7 = vpop.xlane.xlu0 %2155 }
 0x71b   : > { %v2158_v8 = vmul.f32 0.03125, %v2156_v7 }
 0x71d   : > { %v2159_v10 = vsub.f32 %v2153_v4, %v2158_v8 }
 0x71f   : > { %v2160_v11 = vmul.f32 %v2159_v10, %v2159_v10 }
 0x721   : > { %v2161_v12 = vsel %vm587_vm1, %v2160_v11, 0.0 }
 0x722   : > { %2162 = vadd.xlane.f32.xlu1 %v2161_v12 }
 0x723   : > { %2808 = shalt.err (!%p2805_p4)
}
 0x724   : > { %s2809_s27 = scalar_lea.hbm %s3386_s19, 512  ;;  %s2813_s13 = scalar_lea.hbm %s3487_s12, 1024 }
 0x725   : > { %p2810_p7 = scmp.ne.s32.totalorder %s3386_s19, %s2809_s27  ;;  %p2814_p1 = scmp.lt.u32.totalorder %s3386_s19, %s3487_s12 }
 0x726   : > { %p2815_p3 = scmp.lt.u32.totalorder %s2813_s13, %s2809_s27  ;;  %p2817_p8 = scmp.lt.u32.totalorder %s2809_s27, %s3386_s19 }
 0x727   : > { %p2811_p10 = pnand %p2810_p7, %p3504_p11 }
 0x728   : > { %p2816_p9 = por %p2815_p3, %p2814_p1 }
 0x729   : > { %p2812_p12 = pneg %p2811_p10 }
 0x72a   : > { %p2818_p0 = por %p2817_p8, %p2816_p9 }
 0x72c   : > { %p2819_p6 = pnand %p2818_p0, %p2812_p12 }
 0x72e   : > { %2822 = shalt.err (!%p2819_p6)
}
 0x72f   : > { %s2922_s25 = smov 128   ;;  %s2923_s21 = smov 8   ;;  %v2439_v16 = vld [vmem:[%s3484_s9] ss:$0 sm:$0xff] }
 0x730   : > { %2658 = dma.vmem_to_hbm [thread:$0]  (%p3504_p11), %s3388_s14, 512, %s3386_s19, %s2191_s20, %s2922_s25, %s2922_s25, %s2923_s21  }
 0x731   : > { %s2386_s27 = sshll.u32 %s3102_s28, 3  ;;  %v2440_v25 = vld [vmem:[%s3485_s10] ss:$0 sm:$0xff]  ;;  %s2443_s30 = sshll.u32 %s2901_s24, 7 }
 0x732   : > { %s507_s0 = scalar_lea.vmem [#allocation5], %s2386_s27  ;;  %s3425_s25 = scalar_lea.hbm %s3486_s11, %s2443_s30 }
 0x733   : > { %s2205_s14 = sshll.u32 %s507_s0, 4  ;;  %s2186_s21 = scalar_lea.sflag [#allocation4], %s3102_s28  ;;  %s3427_s14 = int_to_ptr.vmem [resolvable:$true] %s2205_s14 }
 0x734   : > { %s2823_s17 = scalar_lea.vmem %s3427_s14, 128  ;;  %s2924_s24 = smov [#allocation5]  }
 0x735   : > { %p2824_p13 = scmp.ne.s32.totalorder %s3427_s14, %s2823_s17  ;;  %s2827_s27 = sshll.u32 %s2924_s24, 4  ;;  %s2828_s27 = int_to_ptr.vmem [resolvable:$false] %s2827_s27 }
 0x736   : > { %s2829_s29 = scalar_lea.vmem %s2828_s27, 256  ;;  %p2830_p4 = scmp.lt.s32.totalorder %s3427_s14, %s2828_s27 }
 0x737   : > { %p2825_p2 = pnand %p2824_p13, %p3504_p11  ;;  %p2831_p7 = scmp.lt.s32.totalorder %s2829_s29, %s2823_s17 }
 0x739   : > { %p2826_p5 = pneg %p2825_p2  ;;  %p2832_p10 = por %p2831_p7, %p2830_p4 }
 0x73b   : > { %p2833_p12 = pnand %p2832_p10, %p2826_p5 }
 0x7af   : > { %v2163_v3 = vpop.xlane.xlu1 %2162 }
 0x7b0   : > { %v2164_v13 = vmul.f32 0.03125, %v2163_v3 }
 0x7b2   : > { %v2165_v14 = vadd.f32 1e-05, %v2164_v13 }
 0x7b4   : > { %2763 = vrsqrt.f32 %v2165_v14 }
 0x7be   : > { %v2764_v15 = vpop.eup %2763 }
 0x7bf   : > { %v2167_v17 = vmul.f32 %v2764_v15, %v2159_v10 }
 0x7c1   : > { %v2175_v18 = vmul.f32 %v2439_v16, %v2167_v17 }
 0x7c3   : > { %v2183_v19 = vadd.f32 %v2440_v25, %v2175_v18 }
 0x7c5   : > { %2184 = vst.msk [vmem:[%s507_s0] sm:$0xff] %vm587_vm1, %v2183_v19 }
 0x7c6   : > { %2836 = shalt.err (!%p2833_p12)
}
 0x7c7   : > { %s2837_s0 = scalar_lea.hbm %s3425_s25, 128  ;;  %s2841_s15 = scalar_lea.hbm %s3486_s11, 256 }
 0x7c8   : > { %p2838_p1 = scmp.ne.s32.totalorder %s3425_s25, %s2837_s0  ;;  %p2842_p8 = scmp.lt.u32.totalorder %s3425_s25, %s3486_s11 }
 0x7c9   : > { %p2843_p0 = scmp.lt.u32.totalorder %s2841_s15, %s2837_s0  ;;  %p2845_p13 = scmp.lt.u32.totalorder %s2837_s0, %s3425_s25 }
 0x7ca   : > { %p2839_p3 = pnand %p2838_p1, %p3504_p11 }
 0x7cb   : > { %p2844_p6 = por %p2843_p0, %p2842_p8 }
 0x7cc   : > { %p2840_p9 = pneg %p2839_p3 }
 0x7cd   : > { %p2846_p2 = por %p2845_p13, %p2844_p6 }
 0x7cf   : > { %p2847_p5 = pnand %p2846_p2, %p2840_p9 }
 0x7d1   : > { %2850 = shalt.err (!%p2847_p5)
}
 0x7d2   : > { %2657 = dma.vmem_to_hbm [thread:$0]  (%p3504_p11), %s3427_s14, 128, %s3425_s25, %s2186_s21  }
 0x7d3 PF: > { %s3505_s20 = sld [smem:[#allocation11_spill]]  ;;  %p3506_p4 = scmp.ne.s32.totalorder %s3500_s18, 0 }
 0x7d4   : > { %p3507_p7 = scmp.ge.s32.totalorder %s2909_s26, 2 }
 0x7d6   : > { %p2666_p10 = pnand %p3507_p7, %p3506_p4 }
 0x7d9   : > { %s2234_s17 = sand.u32 1, %s3505_s20  }
 0x7da   : > { %s2235_s24 = scalar_lea.sflag [#allocation4], %s2234_s17 }
 0x7db   : > { %2880 = dma.done.wait (!%p2666_p10), %s2235_s24, 128  }
 0x7dc   : > { %2882 = vsyncadd (!%p2666_p10), %s2235_s24, 4294967168  ;;  %s2244_s27 = scalar_lea.sflag [#allocation7], %s2234_s17 }
 0x7dd   : > { %2884 = dma.done.wait (!%p2666_p10), %s2244_s27, 512  }
 0x7de   : > { %2886 = vsyncadd (!%p2666_p10), %s2244_s27, 4294966784  ;;  %s32_s26 = sadd.s32 1, %s2909_s26   ;;  %s3508_s16 = sld [smem:[#allocation14_spill]] }
 0x7df   : > { %p29_p12 = scmp.ge.s32.totalorder %s32_s26, 4   ;;  %s3509_s24 = sld [smem:[#allocation12_spill]] }
 0x7e0   : > { %s3510_s25 = sld [smem:[#allocation13_spill]]  ;;  %s3511_s21 = smov %s2893_s22 }
 0x7e1   : > { %s3512_s22 = smov %s2897_s23  ;;  %31 = sbr.rel (!%p29_p12) target bundleno = 10 (0xa), region = 138 }
 0x7e4   : > { %s3513_s23 = smov %s3508_s16 }
 0x7e8   :  { %2249 = vsyncpa [#allocation3], 1 }
 0x7e9   :  { %2251 = vsyncpa [#allocation3 + $0x1], 1 }
 0x7ea   :  { %2252 = vsyncpa [#allocation4], 1 }
 0x7eb   :  { %2254 = vsyncpa [#allocation4 + $0x1], 1 }
 0x7ec   :  { %2255 = vsyncpa [#allocation7], 1 }
 0x7ed   :  { %2257 = vsyncpa [#allocation7 + $0x1], 1 }

</bundles_post_ra>
